<compile_context>
chip_gen: v7x
topology: tpu7x:2x2x1
jax: 0.10.0
libtpu: 0.0.40
codegen_flags: <defaults>
</compile_context>

<pallas_src>
import functools

import jax
import jax.numpy as jnp
from jax.experimental import pallas as pl
from jax.experimental.pallas import tpu as pltpu

MAX_DIM = 64 * 16
EPS = 1e-5
LRELU_SLOPE = 0.2

_LANE = 128       # vreg lane width; packed output channels padded to a multiple of this
_NSPLIT = 2       # leading "parallel" grid axis of pass 1 (covers both v7x TensorCores)
_FORCE_TM = None  # test hook: force a tiny row tile to exercise the multi-tile path


def _tpu_budget():
    """Generation-aware (row-tile cap, scoped-VMEM limit)."""
    try:
        vmem = int(getattr(pltpu.get_tpu_info(), "vmem_capacity_bytes", 0))
    except Exception:
        vmem = 0
    if vmem >= 96 * 1024 * 1024:           # v5e / v6e: 128 MiB physical VMEM
        return 1024, 64 * 1024 * 1024
    return 1024, 48 * 1024 * 1024          # v7x (64 MiB) / unknown: keep headroom


_TM_MAX, _VMEM_LIMIT = _tpu_budget()


def _round_up(x, m):
    return ((x + m - 1) // m) * m


def _apply_act(y, act):
    if act == "lrelu":
        return jnp.where(y >= 0.0, y, LRELU_SLOPE * y)
    if act == "relu":
        return jnp.maximum(y, 0.0)
    if act == "tanh":
        return jnp.tanh(y)
    return y


def _cparams(sem):
    return pltpu.CompilerParams(dimension_semantics=sem, vmem_limit_bytes=_VMEM_LIMIT)


# ----------------------------------------------------------------------------
# Pallas kernels
# ----------------------------------------------------------------------------
def _bn_scale_shift(s, ss, gamma, beta, count):
    """Per-column scale/shift from sum / sum-of-squares (training batch stats)."""
    inv_n = 1.0 / count
    mean = s * inv_n
    var = jnp.maximum(ss * inv_n - mean * mean, 0.0)
    scale = gamma * jax.lax.rsqrt(var + EPS)
    shift = beta - mean * scale
    return scale, shift


def _fused_bn_act_kernel(p_ref, w_ref, g_ref, b_ref, o_ref, *, count, act):
    """Single-tile layer (groups == 1): matmul + BatchNorm + activation in one pass."""
    y = jnp.dot(p_ref[...], w_ref[...], preferred_element_type=jnp.float32)
    s = jnp.sum(y, axis=0, keepdims=True)
    ss = jnp.sum(y * y, axis=0, keepdims=True)
    scale, shift = _bn_scale_shift(s, ss, g_ref[...], b_ref[...], count)
    o_ref[...] = _apply_act(y * scale + shift, act).astype(o_ref.dtype)


def _fused_bn_act_pool_kernel(p_ref, w_ref, pool_ref, g_ref, b_ref, o_ref, *, count, act):
    """Single-tile ConvT layer: stats pooled across phase groups with a tiny 0/1
    pool-and-broadcast matmul (avoids lane-dim reshapes inside the kernel)."""
    y = jnp.dot(p_ref[...], w_ref[...], preferred_element_type=jnp.float32)
    s = jnp.sum(y, axis=0, keepdims=True)
    ss = jnp.sum(y * y, axis=0, keepdims=True)
    stats = jnp.concatenate([s, ss], axis=0)                        # (2, gc) f32
    pooled = jnp.dot(stats, pool_ref[...], preferred_element_type=jnp.float32)
    scale, shift = _bn_scale_shift(pooled[0:1, :], pooled[1:2, :],
                                   g_ref[...], b_ref[...], count)
    o_ref[...] = _apply_act(y * scale + shift, act).astype(o_ref.dtype)


def _matmul_stats_kernel(p_ref, w_ref, y_ref, stats_ref):
    """Pass 1 (multi-tile M): y = p @ w (bf16 in, f32 acc); per-column sum and
    sum-of-squares accumulated from the f32 result (before the bf16 downcast)
    into a per-core resident block.  Grid = (core, M tile) = (parallel, arbitrary)."""
    y = jnp.dot(p_ref[...], w_ref[...], preferred_element_type=jnp.float32)
    y_ref[...] = y.astype(y_ref.dtype)

    @pl.when(pl.program_id(1) == 0)
    def _():
        stats_ref[...] = jnp.zeros_like(stats_ref)

    s = jnp.sum(y, axis=0, keepdims=True)
    ss = jnp.sum(y * y, axis=0, keepdims=True)
    stats_ref[...] = stats_ref[...] + jnp.concatenate([s, ss], axis=0)[None]


def _scale_shift_act_kernel(y_ref, sc_ref, sh_ref, o_ref, *, act):
    """Pass 2 (multi-tile M): precomputed per-column scale/shift + activation."""
    y = y_ref[...].astype(jnp.float32)
    o_ref[...] = _apply_act(y * sc_ref[...] + sh_ref[...], act).astype(o_ref.dtype)


def _matmul_bias_act_kernel(p_ref, w_ref, b_ref, o_ref, *, act):
    """Norm-free layer: matmul + bias + activation in a single pipelined pass."""
    y = jnp.dot(p_ref[...], w_ref[...], preferred_element_type=jnp.float32)
    o_ref[...] = _apply_act(y + b_ref[...], act).astype(o_ref.dtype)


# ----------------------------------------------------------------------------
# Fused layer wrapper: packing, padding, path selection, tiling
# ----------------------------------------------------------------------------
def _pool_matrix(groups, cout, gc):
    """(gc, gc) 0/1 matrix pooling column stats over the `groups` phase copies of
    each channel and re-broadcasting the pooled value back to every copy."""
    v = groups * cout
    c_idx = jnp.arange(v) % cout
    p = (c_idx[:, None] == c_idx[None, :]).astype(jnp.float32)
    return jnp.pad(p, ((0, gc - v), (0, gc - v)))


def _tile_pad_vec(vec, cout, groups, gc):
    """(cout,) -> (1, gc): phase-major tiling + lane padding (zeros in padded lanes)."""
    t = jnp.tile(vec.reshape(1, cout).astype(jnp.float32), (1, groups))
    return jnp.pad(t, ((0, 0), (0, gc - groups * cout)))


def _fused_layer(patches, w2, bias, gamma, beta, cout, *, groups, norm, act,
                 out_dtype=jnp.bfloat16):
    """(M, K) patches x (K, groups*cout) weight -> (M, groups, cout) with fused
    BatchNorm (batch stats) or bias, plus activation.  Output columns are packed
    phase-major / channel-minor and padded to a multiple of 128 lanes."""
    m, k = patches.shape
    v = groups * cout
    gc = _round_up(v, _LANE)
    k_pad = _round_up(k, 8)
    tm_max = _FORCE_TM if _FORCE_TM else _TM_MAX

    if patches.dtype != jnp.bfloat16:           # previous layer already emits bf16
        patches = patches.astype(jnp.bfloat16)
    # Weight prep is constant-folded by XLA (params are closure constants).
    w_p = jnp.pad(w2, ((0, k_pad - k), (0, gc - v))).astype(jnp.bfloat16)

    m1 = _round_up(m, 8)
    count = float(m * groups)                   # spatial positions per channel

    # ---- fused single-tile path: one pallas_call, no intermediate-y HBM trip ----
    fused_bytes = (m1 * k_pad + k_pad * gc + m1 * gc) * 2 + m1 * gc * 4 + gc * gc * 4
    if norm and m1 <= tm_max and fused_bytes <= _VMEM_LIMIT // 2:
        p_pad = jnp.pad(patches, ((0, m1 - m), (0, k_pad - k)))
        g_t = _tile_pad_vec(gamma, cout, groups, gc)
        b_t = _tile_pad_vec(beta, cout, groups, gc)

        def full(shape):
            return pl.BlockSpec(shape, lambda *_: (0,) * len(shape))

        if groups > 1:
            kern = functools.partial(_fused_bn_act_pool_kernel, count=count, act=act)
            in_specs = [full((m1, k_pad)), full((k_pad, gc)), full((gc, gc)),
                        full((1, gc)), full((1, gc))]
            args = (p_pad, w_p, _pool_matrix(groups, cout, gc), g_t, b_t)
        else:
            kern = functools.partial(_fused_bn_act_kernel, count=count, act=act)
            in_specs = [full((m1, k_pad)), full((k_pad, gc)),
                        full((1, gc)), full((1, gc))]
            args = (p_pad, w_p, g_t, b_t)

        out = pl.pallas_call(
            kern,
            out_shape=jax.ShapeDtypeStruct((m1, gc), out_dtype),
            grid=(1,),
            in_specs=in_specs,
            out_specs=full((m1, gc)),
            compiler_params=_cparams(("arbitrary",)),
        )(*args)
        return out[:m, :v].reshape(m, groups, cout)

    if norm:
        # ---- multi-tile two-pass path -----------------------------------------
        tm = min(tm_max, m1)

        def _step_bytes(t):   # double-buffered in/out tiles + f32 compute value
            return 2 * (t * k_pad * 2 + t * gc * 2 + k_pad * gc * 2) + t * gc * 4

        while tm > 8 and _step_bytes(tm) > _VMEM_LIMIT // 2:
            tm = max(8, (tm // 2) // 8 * 8)

        m_pad = _round_up(m, _NSPLIT * tm)
        tiles = m_pad // tm
        tps = tiles // _NSPLIT                      # tiles per core split
        p_pad = jnp.pad(patches, ((0, m_pad - m), (0, k_pad - k)))

        y, stats = pl.pallas_call(
            _matmul_stats_kernel,
            out_shape=(jax.ShapeDtypeStruct((m_pad, gc), jnp.bfloat16),
                       jax.ShapeDtypeStruct((_NSPLIT, 2, gc), jnp.float32)),
            grid=(_NSPLIT, tps),
            in_specs=[pl.BlockSpec((tm, k_pad), lambda c, i: (c * tps + i, 0)),
                      pl.BlockSpec((k_pad, gc), lambda c, i: (0, 0))],
            out_specs=(pl.BlockSpec((tm, gc), lambda c, i: (c * tps + i, 0)),
                       pl.BlockSpec((1, 2, gc), lambda c, i: (c, 0, 0))),
            compiler_params=_cparams(("parallel", "arbitrary")),
        )(p_pad, w_p)

        # Tiny per-channel glue: merge per-core partials, pool phase groups, fold
        # gamma/beta into one per-column scale/shift (keeps pass 2 memory bound only).
        st = stats.sum(axis=0)[:, :v].reshape(2, groups, cout).sum(axis=1)
        mean = st[0] / count
        var = jnp.maximum(st[1] / count - mean * mean, 0.0)
        scale_c = gamma.astype(jnp.float32) * jax.lax.rsqrt(var + EPS)
        shift_c = beta.astype(jnp.float32) - mean * scale_c
        sc_t = _tile_pad_vec(scale_c, cout, groups, gc)
        sh_t = _tile_pad_vec(shift_c, cout, groups, gc)

        row = pl.BlockSpec((tm, gc), lambda i: (i, 0))
        vec = pl.BlockSpec((1, gc), lambda i: (0, 0))
        out = pl.pallas_call(
            functools.partial(_scale_shift_act_kernel, act=act),
            out_shape=jax.ShapeDtypeStruct((m_pad, gc), out_dtype),
            grid=(tiles,),
            in_specs=[row, vec, vec],
            out_specs=row,
            compiler_params=_cparams(("parallel",)),
        )(y, sc_t, sh_t)
    else:
        # ---- norm-free layer: matmul + bias + activation, pipelined over M ------
        tm = min(tm_max, m1)
        while tm > 8 and 2 * (tm * k_pad * 2 + tm * gc * 2 + k_pad * gc * 2) > _VMEM_LIMIT // 2:
            tm = max(8, (tm // 2) // 8 * 8)
        m_pad = _round_up(m, tm)
        p_pad = jnp.pad(patches, ((0, m_pad - m), (0, k_pad - k)))
        b_t = _tile_pad_vec(bias, cout, groups, gc)
        row_in = pl.BlockSpec((tm, k_pad), lambda i: (i, 0))
        row_out = pl.BlockSpec((tm, gc), lambda i: (i, 0))
        vec = pl.BlockSpec((1, gc), lambda i: (0, 0))
        out = pl.pallas_call(
            functools.partial(_matmul_bias_act_kernel, act=act),
            out_shape=jax.ShapeDtypeStruct((m_pad, gc), out_dtype),
            grid=(m_pad // tm,),
            in_specs=[row_in, pl.BlockSpec((k_pad, gc), lambda i: (0, 0)), vec],
            out_specs=row_out,
            compiler_params=_cparams(("parallel",)),
        )(p_pad, w_p, b_t)

    return out[:m, :v].reshape(m, groups, cout)


# ----------------------------------------------------------------------------
# JAX glue: patch extraction & weight rearrangement (pure data layout)
# ----------------------------------------------------------------------------
def _im2col_nhwc(x, kh, kw, stride, pad):
    """x: (N, H, W, C) -> ((N*Ho*Wo, kh*kw*C), Ho, Wo).  K ordering: (dy, dx, c)."""
    if pad:
        x = jnp.pad(x, ((0, 0), (pad, pad), (pad, pad), (0, 0)))
    n, h, w, c = x.shape
    ho = (h - kh) // stride + 1
    wo = (w - kw) // stride + 1
    taps = []
    for dy in range(kh):
        for dx in range(kw):
            taps.append(x[:, dy:dy + stride * (ho - 1) + 1:stride,
                          dx:dx + stride * (wo - 1) + 1:stride, :])
    p = jnp.stack(taps, axis=3)                        # (N, Ho, Wo, kh*kw, C)
    return p.reshape(n * ho * wo, kh * kw * c), ho, wo


def _convT_subpixel_weight(w):
    """PyTorch ConvTranspose2d weight (Cin, Cout, 4, 4), stride=2, pad=1 ->
    equivalent stride-1 3x3 weight producing 4 output phases: (9*Cin, 4*Cout).

    out[n, 2u+r, 2v+s, co] = sum_{dy,dx,ci} xpad1[n, u+dy, v+dx, ci] * W[dy,dx,ci,r,s,co]
    where only the taps below are non-zero (the rest multiply padding / unused rows).
    """
    cin, cout = w.shape[0], w.shape[1]
    taps = {0: ((0, 3), (1, 1)),    # even output row: ky=3 @ dy=0, ky=1 @ dy=1
            1: ((1, 2), (2, 0))}    # odd  output row: ky=2 @ dy=1, ky=0 @ dy=2
    wc = jnp.zeros((3, 3, cin, 2, 2, cout), w.dtype)
    for r in (0, 1):
        for s in (0, 1):
            for dy, ky in taps[r]:
                for dx, kx in taps[s]:
                    wc = wc.at[dy, dx, :, r, s, :].set(w[:, :, ky, kx])
    return wc.reshape(9 * cin, 4 * cout)


def conv2d_block(x, w, b, gamma, beta, *, stride, pad, norm, act,
                 out_dtype=jnp.bfloat16):
    """Conv2d (PyTorch weight (Cout, Cin, kh, kw)) + BN + act.  x is NHWC bf16."""
    cout, cin, kh, kw = w.shape
    n = x.shape[0]
    # TODO(synk): fold the im2col gather into the kernel with a halo'd manual DMA to
    # remove the remaining 4-9x patch-matrix HBM amplification at large img_size.
    patches, ho, wo = _im2col_nhwc(x, kh, kw, stride, pad)
    w2 = jnp.transpose(w, (2, 3, 1, 0)).reshape(kh * kw * cin, cout)
    y = _fused_layer(patches, w2, b, gamma, beta, cout, groups=1, norm=norm, act=act,
                     out_dtype=out_dtype)
    return y.reshape(n, ho, wo, cout)


def conv_transpose2d_block(x, w, b, gamma, beta, *, norm, act,
                           out_dtype=jnp.bfloat16):
    """ConvTranspose2d(4x4, stride 2, pad 1) + BN + act via sub-pixel decomposition:
    one 3x3 stride-1 conv produces 4 packed phase groups; a pixel shuffle
    interleaves them into the 2x-upsampled output."""
    cout = w.shape[1]
    n, h, wd, _ = x.shape
    patches, _, _ = _im2col_nhwc(x, 3, 3, 1, 1)
    w2 = _convT_subpixel_weight(w)
    y = _fused_layer(patches, w2, b, gamma, beta, cout, groups=4, norm=norm, act=act,
                     out_dtype=out_dtype)
    y = y.reshape(n, h, wd, 2, 2, cout)                       # (n, u, v, r, s, c)
    return jnp.transpose(y, (0, 1, 3, 2, 4, 5)).reshape(n, 2 * h, 2 * wd, cout)


# ----------------------------------------------------------------------------
# Att module (parameter construction mirrors the PyTorch __init__ exactly)
# ----------------------------------------------------------------------------
class AttPallas:
    """Pallas port of Att: NHWC bf16 internally, f32 NCHW at the public interface."""

    def __init__(self, key, enc_dim=8, enc_layers=3, dec_dim=8, dec_layers=3,
                 n_attrs=1, shortcut_layers=1, inject_layers=0, img_size=16):
        self.shortcut_layers = min(shortcut_layers, dec_layers - 1)
        self.inject_layers = min(inject_layers, dec_layers - 1)
        self.f_size = img_size // 2 ** enc_layers
        self.n_attrs = n_attrs

        keys = iter(jax.random.split(key, 4 * (enc_layers + dec_layers)))

        def make_params(w_shape, cout):
            kw_, kb, kg, kbt = next(keys), next(keys), next(keys), next(keys)
            fan_in = w_shape[1] * w_shape[2] * w_shape[3]
            scale = 1.0 / (fan_in ** 0.5)
            return {
                "w": jax.random.normal(kw_, w_shape, jnp.float32) * scale,
                "b": jax.random.normal(kb, (cout,), jnp.float32) * 0.01,
                "gamma": 1.0 + 0.01 * jax.random.normal(kg, (cout,), jnp.float32),
                "beta": 0.01 * jax.random.normal(kbt, (cout,), jnp.float32),
            }

        # Encoder: Conv2dBlock(4x4, stride 2, pad 1, batchnorm, lrelu)
        self.enc_params, self.enc_cfg = [], []
        n_in = 3
        for i in range(enc_layers):
            n_out = min(enc_dim * 2 ** i, MAX_DIM)
            self.enc_params.append(make_params((n_out, n_in, 4, 4), n_out))
            self.enc_cfg.append(dict(norm=True, act="lrelu"))
            n_in = n_out

        # Decoder: ConvTranspose2dBlock(4x4, stride 2, pad 1)
        self.dec_params, self.dec_cfg = [], []
        n_in = n_in + n_attrs
        for i in range(dec_layers):
            if i < dec_layers - 1:
                n_out = min(dec_dim * 2 ** (dec_layers - i - 1), MAX_DIM)
                self.dec_params.append(make_params((n_in, n_out, 4, 4), n_out))
                self.dec_cfg.append(dict(norm=True, act="relu"))
                n_in = n_out
                n_in = n_in + n_in // 2 if self.shortcut_layers > i else n_in
                n_in = n_in + n_attrs if self.inject_layers > i else n_in
            else:
                self.dec_params.append(make_params((n_in, 3, 4, 4), 3))
                self.dec_cfg.append(dict(norm=False, act="tanh"))

    # -- internal NHWC bf16 paths -----------------------------------------------
    def _encode(self, x):
        z, zs = x, []
        for p, cfg in zip(self.enc_params, self.enc_cfg):
            z = conv2d_block(z, p["w"], p["b"], p["gamma"], p["beta"],
                             stride=2, pad=1, **cfg)
            zs.append(z)
        return zs

    def _decode(self, zs, a):
        b = a.shape[0]
        a_tile = jnp.broadcast_to(a.reshape(b, 1, 1, -1),
                                  (b, self.f_size, self.f_size, self.n_attrs))
        z = jnp.concatenate([zs[-1], a_tile.astype(zs[-1].dtype)], axis=-1)
        n_dec = len(self.dec_params)
        for i, (p, cfg) in enumerate(zip(self.dec_params, self.dec_cfg)):
            od = jnp.float32 if i == n_dec - 1 else jnp.bfloat16
            z = conv_transpose2d_block(z, p["w"], p["b"], p["gamma"], p["beta"],
                                       out_dtype=od, **cfg)
            if self.shortcut_layers > i:
                z = jnp.concatenate([z, zs[n_dec - 2 - i].astype(z.dtype)], axis=-1)
            if self.inject_layers > i:
                s = self.f_size * 2 ** (i + 1)
                a_t = jnp.broadcast_to(a.reshape(b, 1, 1, -1),
                                       (b, s, s, self.n_attrs)).astype(z.dtype)
                z = jnp.concatenate([z, a_t], axis=-1)
        return z

    # -- public NCHW f32 interface (matches the PyTorch module) ------------------
    def encode(self, x):
        zs = self._encode(jnp.transpose(x, (0, 2, 3, 1)).astype(jnp.bfloat16))
        return [jnp.transpose(z, (0, 3, 1, 2)).astype(jnp.float32) for z in zs]

    def decode(self, zs, a):
        zs_nhwc = [jnp.transpose(z, (0, 2, 3, 1)).astype(jnp.bfloat16) for z in zs]
        return jnp.transpose(self._decode(zs_nhwc, a), (0, 3, 1, 2))

    def forward(self, x, a=None, mode="enc-dec"):
        if mode == "enc-dec":
            zs = self._encode(jnp.transpose(x, (0, 2, 3, 1)).astype(jnp.bfloat16))
            out = self._decode(zs, a)
            return (jnp.transpose(out, (0, 3, 1, 2)),)
        if mode == "enc":
            return self.encode(x)
        if mode == "dec":
            assert a is not None, "No given attribute."
            return self.decode(x, a)
        raise Exception("Unrecognized mode: " + mode)


# ----------------------------------------------------------------------------
if __name__ == "__main__":
    key = jax.random.PRNGKey(0)
    k_param, k_x, k_a = jax.random.split(key, 3)

    model = AttPallas(k_param, enc_dim=8, enc_layers=3, dec_dim=8, dec_layers=3,
                      n_attrs=1, shortcut_layers=1, inject_layers=0, img_size=16)

    x = jax.random.normal(k_x, (2, 3, 16, 16), jnp.float32)   # NCHW, like PyTorch
    a = jax.random.normal(k_a, (2, 1), jnp.float32)           # attribute vector

    # jit the whole forward so per-layer pallas_call dispatch is amortized into
    # a single XLA executable.
    fwd = jax.jit(lambda x_, a_: model.forward(x_, a_, mode="enc-dec"))
    (out,) = fwd(x, a)
    out = jax.block_until_ready(out)

    assert out.shape == (2, 3, 16, 16), out.shape
    assert out.dtype == jnp.float32
    assert bool(jnp.all(jnp.isfinite(out)))
    assert bool(jnp.all(jnp.abs(out) <= 1.0))  # final tanh

    # Cross-check: force a tiny row tile so the first encoder layer exercises the
    # multi-tile two-pass (core-split) path and compare it with the fused path.
    p0 = model.enc_params[0]
    x_nhwc = jnp.transpose(x, (0, 2, 3, 1)).astype(jnp.bfloat16)

    def run_layer():
        return conv2d_block(x_nhwc, p0["w"], p0["b"], p0["gamma"], p0["beta"],
                            stride=2, pad=1, norm=True, act="lrelu")

    fused_out = jax.block_until_ready(run_layer())
    _FORCE_TM = 32
    two_pass_out = jax.block_until_ready(run_layer())
    _FORCE_TM = None
    assert bool(jnp.allclose(fused_out.astype(jnp.float32),
                             two_pass_out.astype(jnp.float32),
                             atol=0.05, rtol=0.05))

    print("KERNEL_OK")
</pallas_src>

<mosaic_0001>
module attributes {stable_mosaic.version = 11 : i64} {
  func.func @_fused_bn_act_kernel(%arg0: i32, %arg1: memref<128x48xbf16, #tpu.memory_space<vmem>>, %arg2: memref<48x128xbf16, #tpu.memory_space<vmem>>, %arg3: memref<1x128xf32, #tpu.memory_space<vmem>>, %arg4: memref<1x128xf32, #tpu.memory_space<vmem>>, %arg5: memref<128x128xbf16, #tpu.memory_space<vmem>>) attributes {dimension_semantics = [#tpu.dimension_semantics<arbitrary>], iteration_bounds = array<i64: 1>, scalar_prefetch = 0 : i64, scratch_operands = 0 : i64, tpu.core_type = #tpu.core_type<tc>, window_params = [{pipeline_mode = #tpu.pipeline_mode<synchronous>, transform_indices = @transform_0, window_bounds = array<i64: 128, 48>}, {pipeline_mode = #tpu.pipeline_mode<synchronous>, transform_indices = @transform_1, window_bounds = array<i64: 48, 128>}, {pipeline_mode = #tpu.pipeline_mode<synchronous>, transform_indices = @transform_2, window_bounds = array<i64: 1, 128>}, {pipeline_mode = #tpu.pipeline_mode<synchronous>, transform_indices = @transform_3, window_bounds = array<i64: 1, 128>}, {pipeline_mode = #tpu.pipeline_mode<synchronous>, transform_indices = @transform_4, window_bounds = array<i64: 128, 128>}]} {
    %c0 = arith.constant 0 : index
    %c0_0 = arith.constant 0 : index
    %0 = vector.load %arg1[%c0, %c0_0] : memref<128x48xbf16, #tpu.memory_space<vmem>>, vector<128x48xbf16>
    %c0_1 = arith.constant 0 : index
    %c0_2 = arith.constant 0 : index
    %1 = vector.load %arg2[%c0_1, %c0_2] : memref<48x128xbf16, #tpu.memory_space<vmem>>, vector<48x128xbf16>
    %cst = arith.constant dense<0.000000e+00> : vector<128x128xf32>
    %2 = tpu.matmul %0, %1, %cst {dimension_numbers = #tpu.dot_dimension_numbers<[1], [0], [0], [1], [0, 0, 1, 1], [], []>} : vector<128x48xbf16>, vector<48x128xbf16>, vector<128x128xf32> -> vector<128x128xf32>
    %cst_3 = arith.constant dense<0.000000e+00> : vector<128xf32>
    %3 = vector.multi_reduction <add>, %2, %cst_3 [0] : vector<128x128xf32> to vector<128xf32>
    %4 = vector.shape_cast %3 : vector<128xf32> to vector<1x128xf32>
    %5 = arith.mulf %2, %2 : vector<128x128xf32>
    %cst_4 = arith.constant dense<0.000000e+00> : vector<128xf32>
    %6 = vector.multi_reduction <add>, %5, %cst_4 [0] : vector<128x128xf32> to vector<128xf32>
    %7 = vector.shape_cast %6 : vector<128xf32> to vector<1x128xf32>
    %c0_5 = arith.constant 0 : index
    %c0_6 = arith.constant 0 : index
    %8 = vector.load %arg3[%c0_5, %c0_6] : memref<1x128xf32, #tpu.memory_space<vmem>>, vector<1x128xf32>
    %c0_7 = arith.constant 0 : index
    %c0_8 = arith.constant 0 : index
    %9 = vector.load %arg4[%c0_7, %c0_8] : memref<1x128xf32, #tpu.memory_space<vmem>>, vector<1x128xf32>
    %cst_9 = arith.constant 7.812500e-03 : f32
    %10 = vector.broadcast %cst_9 : f32 to vector<1x128xf32>
    %11 = arith.mulf %4, %10 : vector<1x128xf32>
    %cst_10 = arith.constant 7.812500e-03 : f32
    %12 = vector.broadcast %cst_10 : f32 to vector<1x128xf32>
    %13 = arith.mulf %7, %12 : vector<1x128xf32>
    %14 = arith.mulf %11, %11 : vector<1x128xf32>
    %15 = arith.subf %13, %14 : vector<1x128xf32>
    %cst_11 = arith.constant 0.000000e+00 : f32
    %16 = vector.broadcast %cst_11 : f32 to vector<1x128xf32>
    %17 = arith.maximumf %15, %16 : vector<1x128xf32>
    %cst_12 = arith.constant 9.99999974E-6 : f32
    %18 = vector.broadcast %cst_12 : f32 to vector<1x128xf32>
    %19 = arith.addf %17, %18 : vector<1x128xf32>
    %20 = math.rsqrt %19 : vector<1x128xf32>
    %21 = arith.mulf %8, %20 : vector<1x128xf32>
    %22 = arith.mulf %11, %21 : vector<1x128xf32>
    %23 = arith.subf %9, %22 : vector<1x128xf32>
    %24 = vector.broadcast %21 : vector<1x128xf32> to vector<128x128xf32>
    %25 = arith.mulf %2, %24 : vector<128x128xf32>
    %26 = vector.broadcast %23 : vector<1x128xf32> to vector<128x128xf32>
    %27 = arith.addf %25, %26 : vector<128x128xf32>
    %cst_13 = arith.constant 0.000000e+00 : f32
    %28 = vector.broadcast %cst_13 : f32 to vector<128x128xf32>
    %29 = arith.cmpf oge, %27, %28 : vector<128x128xf32>
    %cst_14 = arith.constant 2.000000e-01 : f32
    %30 = vector.broadcast %cst_14 : f32 to vector<128x128xf32>
    %31 = arith.mulf %30, %27 : vector<128x128xf32>
    %32 = arith.select %29, %27, %31 : vector<128x128xi1>, vector<128x128xf32>
    %33 = arith.truncf %32 : vector<128x128xf32> to vector<128x128xbf16>
    %c0_15 = arith.constant 0 : index
    %c0_16 = arith.constant 0 : index
    %34 = vector.load %arg5[%c0_15, %c0_16] : memref<128x128xbf16, #tpu.memory_space<vmem>>, vector<128x128xbf16>
    tpu.vector_store %arg5[%c0_15, %c0_16], %33 {strides = array<i32>} : memref<128x128xbf16, #tpu.memory_space<vmem>>, vector<128x128xbf16>,
    return
  }
  func.func @transform_0(%arg0: i32) -> (i32, i32) {
    %c0_i32 = arith.constant 0 : i32
    %c0_i32_0 = arith.constant 0 : i32
    %c0_i32_1 = arith.constant 0 : i32
    return %c0_i32, %c0_i32_0 : i32, i32
  }
  func.func @transform_1(%arg0: i32) -> (i32, i32) {
    %c0_i32 = arith.constant 0 : i32
    %c0_i32_0 = arith.constant 0 : i32
    %c0_i32_1 = arith.constant 0 : i32
    return %c0_i32, %c0_i32_0 : i32, i32
  }
  func.func @transform_2(%arg0: i32) -> (i32, i32) {
    %c0_i32 = arith.constant 0 : i32
    %c0_i32_0 = arith.constant 0 : i32
    %c0_i32_1 = arith.constant 0 : i32
    return %c0_i32, %c0_i32_0 : i32, i32
  }
  func.func @transform_3(%arg0: i32) -> (i32, i32) {
    %c0_i32 = arith.constant 0 : i32
    %c0_i32_0 = arith.constant 0 : i32
    %c0_i32_1 = arith.constant 0 : i32
    return %c0_i32, %c0_i32_0 : i32, i32
  }
  func.func @transform_4(%arg0: i32) -> (i32, i32) {
    %c0_i32 = arith.constant 0 : i32
    %c0_i32_0 = arith.constant 0 : i32
    %c0_i32_1 = arith.constant 0 : i32
    return %c0_i32, %c0_i32_0 : i32, i32
  }
}

module attributes {stable_mosaic.version = 11 : i64} {
  func.func @_fused_bn_act_kernel(%arg0: i32, %arg1: memref<32x128xbf16, #tpu.memory_space<vmem>>, %arg2: memref<128x128xbf16, #tpu.memory_space<vmem>>, %arg3: memref<1x128xf32, #tpu.memory_space<vmem>>, %arg4: memref<1x128xf32, #tpu.memory_space<vmem>>, %arg5: memref<32x128xbf16, #tpu.memory_space<vmem>>) attributes {dimension_semantics = [#tpu.dimension_semantics<arbitrary>], iteration_bounds = array<i64: 1>, scalar_prefetch = 0 : i64, scratch_operands = 0 : i64, tpu.core_type = #tpu.core_type<tc>, window_params = [{pipeline_mode = #tpu.pipeline_mode<synchronous>, transform_indices = @transform_0, window_bounds = array<i64: 32, 128>}, {pipeline_mode = #tpu.pipeline_mode<synchronous>, transform_indices = @transform_1, window_bounds = array<i64: 128, 128>}, {pipeline_mode = #tpu.pipeline_mode<synchronous>, transform_indices = @transform_2, window_bounds = array<i64: 1, 128>}, {pipeline_mode = #tpu.pipeline_mode<synchronous>, transform_indices = @transform_3, window_bounds = array<i64: 1, 128>}, {pipeline_mode = #tpu.pipeline_mode<synchronous>, transform_indices = @transform_4, window_bounds = array<i64: 32, 128>}]} {
    %c0 = arith.constant 0 : index
    %c0_0 = arith.constant 0 : index
    %0 = vector.load %arg1[%c0, %c0_0] : memref<32x128xbf16, #tpu.memory_space<vmem>>, vector<32x128xbf16>
    %c0_1 = arith.constant 0 : index
    %c0_2 = arith.constant 0 : index
    %1 = vector.load %arg2[%c0_1, %c0_2] : memref<128x128xbf16, #tpu.memory_space<vmem>>, vector<128x128xbf16>
    %cst = arith.constant dense<0.000000e+00> : vector<32x128xf32>
    %2 = tpu.matmul %0, %1, %cst {dimension_numbers = #tpu.dot_dimension_numbers<[1], [0], [0], [1], [0, 0, 1, 1], [], []>} : vector<32x128xbf16>, vector<128x128xbf16>, vector<32x128xf32> -> vector<32x128xf32>
    %cst_3 = arith.constant dense<0.000000e+00> : vector<128xf32>
    %3 = vector.multi_reduction <add>, %2, %cst_3 [0] : vector<32x128xf32> to vector<128xf32>
    %4 = vector.shape_cast %3 : vector<128xf32> to vector<1x128xf32>
    %5 = arith.mulf %2, %2 : vector<32x128xf32>
    %cst_4 = arith.constant dense<0.000000e+00> : vector<128xf32>
    %6 = vector.multi_reduction <add>, %5, %cst_4 [0] : vector<32x128xf32> to vector<128xf32>
    %7 = vector.shape_cast %6 : vector<128xf32> to vector<1x128xf32>
    %c0_5 = arith.constant 0 : index
    %c0_6 = arith.constant 0 : index
    %8 = vector.load %arg3[%c0_5, %c0_6] : memref<1x128xf32, #tpu.memory_space<vmem>>, vector<1x128xf32>
    %c0_7 = arith.constant 0 : index
    %c0_8 = arith.constant 0 : index
    %9 = vector.load %arg4[%c0_7, %c0_8] : memref<1x128xf32, #tpu.memory_space<vmem>>, vector<1x128xf32>
    %cst_9 = arith.constant 3.125000e-02 : f32
    %10 = vector.broadcast %cst_9 : f32 to vector<1x128xf32>
    %11 = arith.mulf %4, %10 : vector<1x128xf32>
    %cst_10 = arith.constant 3.125000e-02 : f32
    %12 = vector.broadcast %cst_10 : f32 to vector<1x128xf32>
    %13 = arith.mulf %7, %12 : vector<1x128xf32>
    %14 = arith.mulf %11, %11 : vector<1x128xf32>
    %15 = arith.subf %13, %14 : vector<1x128xf32>
    %cst_11 = arith.constant 0.000000e+00 : f32
    %16 = vector.broadcast %cst_11 : f32 to vector<1x128xf32>
    %17 = arith.maximumf %15, %16 : vector<1x128xf32>
    %cst_12 = arith.constant 9.99999974E-6 : f32
    %18 = vector.broadcast %cst_12 : f32 to vector<1x128xf32>
    %19 = arith.addf %17, %18 : vector<1x128xf32>
    %20 = math.rsqrt %19 : vector<1x128xf32>
    %21 = arith.mulf %8, %20 : vector<1x128xf32>
    %22 = arith.mulf %11, %21 : vector<1x128xf32>
    %23 = arith.subf %9, %22 : vector<1x128xf32>
    %24 = vector.broadcast %21 : vector<1x128xf32> to vector<32x128xf32>
    %25 = arith.mulf %2, %24 : vector<32x128xf32>
    %26 = vector.broadcast %23 : vector<1x128xf32> to vector<32x128xf32>
    %27 = arith.addf %25, %26 : vector<32x128xf32>
    %cst_13 = arith.constant 0.000000e+00 : f32
    %28 = vector.broadcast %cst_13 : f32 to vector<32x128xf32>
    %29 = arith.cmpf oge, %27, %28 : vector<32x128xf32>
    %cst_14 = arith.constant 2.000000e-01 : f32
    %30 = vector.broadcast %cst_14 : f32 to vector<32x128xf32>
    %31 = arith.mulf %30, %27 : vector<32x128xf32>
    %32 = arith.select %29, %27, %31 : vector<32x128xi1>, vector<32x128xf32>
    %33 = arith.truncf %32 : vector<32x128xf32> to vector<32x128xbf16>
    %c0_15 = arith.constant 0 : index
    %c0_16 = arith.constant 0 : index
    %34 = vector.load %arg5[%c0_15, %c0_16] : memref<32x128xbf16, #tpu.memory_space<vmem>>, vector<32x128xbf16>
    tpu.vector_store %arg5[%c0_15, %c0_16], %33 {strides = array<i32>} : memref<32x128xbf16, #tpu.memory_space<vmem>>, vector<32x128xbf16>,
    return
  }
  func.func @transform_0(%arg0: i32) -> (i32, i32) {
    %c0_i32 = arith.constant 0 : i32
    %c0_i32_0 = arith.constant 0 : i32
    %c0_i32_1 = arith.constant 0 : i32
    return %c0_i32, %c0_i32_0 : i32, i32
  }
  func.func @transform_1(%arg0: i32) -> (i32, i32) {
    %c0_i32 = arith.constant 0 : i32
    %c0_i32_0 = arith.constant 0 : i32
    %c0_i32_1 = arith.constant 0 : i32
    return %c0_i32, %c0_i32_0 : i32, i32
  }
  func.func @transform_2(%arg0: i32) -> (i32, i32) {
    %c0_i32 = arith.constant 0 : i32
    %c0_i32_0 = arith.constant 0 : i32
    %c0_i32_1 = arith.constant 0 : i32
    return %c0_i32, %c0_i32_0 : i32, i32
  }
  func.func @transform_3(%arg0: i32) -> (i32, i32) {
    %c0_i32 = arith.constant 0 : i32
    %c0_i32_0 = arith.constant 0 : i32
    %c0_i32_1 = arith.constant 0 : i32
    return %c0_i32, %c0_i32_0 : i32, i32
  }
  func.func @transform_4(%arg0: i32) -> (i32, i32) {
    %c0_i32 = arith.constant 0 : i32
    %c0_i32_0 = arith.constant 0 : i32
    %c0_i32_1 = arith.constant 0 : i32
    return %c0_i32, %c0_i32_0 : i32, i32
  }
}

module attributes {stable_mosaic.version = 11 : i64} {
  func.func @_fused_bn_act_kernel(%arg0: i32, %arg1: memref<8x256xbf16, #tpu.memory_space<vmem>>, %arg2: memref<256x128xbf16, #tpu.memory_space<vmem>>, %arg3: memref<1x128xf32, #tpu.memory_space<vmem>>, %arg4: memref<1x128xf32, #tpu.memory_space<vmem>>, %arg5: memref<8x128xbf16, #tpu.memory_space<vmem>>) attributes {dimension_semantics = [#tpu.dimension_semantics<arbitrary>], iteration_bounds = array<i64: 1>, scalar_prefetch = 0 : i64, scratch_operands = 0 : i64, tpu.core_type = #tpu.core_type<tc>, window_params = [{pipeline_mode = #tpu.pipeline_mode<synchronous>, transform_indices = @transform_0, window_bounds = array<i64: 8, 256>}, {pipeline_mode = #tpu.pipeline_mode<synchronous>, transform_indices = @transform_1, window_bounds = array<i64: 256, 128>}, {pipeline_mode = #tpu.pipeline_mode<synchronous>, transform_indices = @transform_2, window_bounds = array<i64: 1, 128>}, {pipeline_mode = #tpu.pipeline_mode<synchronous>, transform_indices = @transform_3, window_bounds = array<i64: 1, 128>}, {pipeline_mode = #tpu.pipeline_mode<synchronous>, transform_indices = @transform_4, window_bounds = array<i64: 8, 128>}]} {
    %c0 = arith.constant 0 : index
    %c0_0 = arith.constant 0 : index
    %0 = vector.load %arg1[%c0, %c0_0] : memref<8x256xbf16, #tpu.memory_space<vmem>>, vector<8x256xbf16>
    %c0_1 = arith.constant 0 : index
    %c0_2 = arith.constant 0 : index
    %1 = vector.load %arg2[%c0_1, %c0_2] : memref<256x128xbf16, #tpu.memory_space<vmem>>, vector<256x128xbf16>
    %cst = arith.constant dense<0.000000e+00> : vector<8x128xf32>
    %2 = tpu.matmul %0, %1, %cst {dimension_numbers = #tpu.dot_dimension_numbers<[1], [0], [0], [1], [0, 0, 1, 1], [], []>} : vector<8x256xbf16>, vector<256x128xbf16>, vector<8x128xf32> -> vector<8x128xf32>
    %cst_3 = arith.constant dense<0.000000e+00> : vector<128xf32>
    %3 = vector.multi_reduction <add>, %2, %cst_3 [0] : vector<8x128xf32> to vector<128xf32>
    %4 = vector.shape_cast %3 : vector<128xf32> to vector<1x128xf32>
    %5 = arith.mulf %2, %2 : vector<8x128xf32>
    %cst_4 = arith.constant dense<0.000000e+00> : vector<128xf32>
    %6 = vector.multi_reduction <add>, %5, %cst_4 [0] : vector<8x128xf32> to vector<128xf32>
    %7 = vector.shape_cast %6 : vector<128xf32> to vector<1x128xf32>
    %c0_5 = arith.constant 0 : index
    %c0_6 = arith.constant 0 : index
    %8 = vector.load %arg3[%c0_5, %c0_6] : memref<1x128xf32, #tpu.memory_space<vmem>>, vector<1x128xf32>
    %c0_7 = arith.constant 0 : index
    %c0_8 = arith.constant 0 : index
    %9 = vector.load %arg4[%c0_7, %c0_8] : memref<1x128xf32, #tpu.memory_space<vmem>>, vector<1x128xf32>
    %cst_9 = arith.constant 1.250000e-01 : f32
    %10 = vector.broadcast %cst_9 : f32 to vector<1x128xf32>
    %11 = arith.mulf %4, %10 : vector<1x128xf32>
    %cst_10 = arith.constant 1.250000e-01 : f32
    %12 = vector.broadcast %cst_10 : f32 to vector<1x128xf32>
    %13 = arith.mulf %7, %12 : vector<1x128xf32>
    %14 = arith.mulf %11, %11 : vector<1x128xf32>
    %15 = arith.subf %13, %14 : vector<1x128xf32>
    %cst_11 = arith.constant 0.000000e+00 : f32
    %16 = vector.broadcast %cst_11 : f32 to vector<1x128xf32>
    %17 = arith.maximumf %15, %16 : vector<1x128xf32>
    %cst_12 = arith.constant 9.99999974E-6 : f32
    %18 = vector.broadcast %cst_12 : f32 to vector<1x128xf32>
    %19 = arith.addf %17, %18 : vector<1x128xf32>
    %20 = math.rsqrt %19 : vector<1x128xf32>
    %21 = arith.mulf %8, %20 : vector<1x128xf32>
    %22 = arith.mulf %11, %21 : vector<1x128xf32>
    %23 = arith.subf %9, %22 : vector<1x128xf32>
    %24 = vector.broadcast %21 : vector<1x128xf32> to vector<8x128xf32>
    %25 = arith.mulf %2, %24 : vector<8x128xf32>
    %26 = vector.broadcast %23 : vector<1x128xf32> to vector<8x128xf32>
    %27 = arith.addf %25, %26 : vector<8x128xf32>
    %cst_13 = arith.constant 0.000000e+00 : f32
    %28 = vector.broadcast %cst_13 : f32 to vector<8x128xf32>
    %29 = arith.cmpf oge, %27, %28 : vector<8x128xf32>
    %cst_14 = arith.constant 2.000000e-01 : f32
    %30 = vector.broadcast %cst_14 : f32 to vector<8x128xf32>
    %31 = arith.mulf %30, %27 : vector<8x128xf32>
    %32 = arith.select %29, %27, %31 : vector<8x128xi1>, vector<8x128xf32>
    %33 = arith.truncf %32 : vector<8x128xf32> to vector<8x128xbf16>
    %c0_15 = arith.constant 0 : index
    %c0_16 = arith.constant 0 : index
    %34 = vector.load %arg5[%c0_15, %c0_16] : memref<8x128xbf16, #tpu.memory_space<vmem>>, vector<8x128xbf16>
    tpu.vector_store %arg5[%c0_15, %c0_16], %33 {strides = array<i32>} : memref<8x128xbf16, #tpu.memory_space<vmem>>, vector<8x128xbf16>,
    return
  }
  func.func @transform_0(%arg0: i32) -> (i32, i32) {
    %c0_i32 = arith.constant 0 : i32
    %c0_i32_0 = arith.constant 0 : i32
    %c0_i32_1 = arith.constant 0 : i32
    return %c0_i32, %c0_i32_0 : i32, i32
  }
  func.func @transform_1(%arg0: i32) -> (i32, i32) {
    %c0_i32 = arith.constant 0 : i32
    %c0_i32_0 = arith.constant 0 : i32
    %c0_i32_1 = arith.constant 0 : i32
    return %c0_i32, %c0_i32_0 : i32, i32
  }
  func.func @transform_2(%arg0: i32) -> (i32, i32) {
    %c0_i32 = arith.constant 0 : i32
    %c0_i32_0 = arith.constant 0 : i32
    %c0_i32_1 = arith.constant 0 : i32
    return %c0_i32, %c0_i32_0 : i32, i32
  }
  func.func @transform_3(%arg0: i32) -> (i32, i32) {
    %c0_i32 = arith.constant 0 : i32
    %c0_i32_0 = arith.constant 0 : i32
    %c0_i32_1 = arith.constant 0 : i32
    return %c0_i32, %c0_i32_0 : i32, i32
  }
  func.func @transform_4(%arg0: i32) -> (i32, i32) {
    %c0_i32 = arith.constant 0 : i32
    %c0_i32_0 = arith.constant 0 : i32
    %c0_i32_1 = arith.constant 0 : i32
    return %c0_i32, %c0_i32_0 : i32, i32
  }
}

module attributes {stable_mosaic.version = 11 : i64} {
  func.func @_fused_bn_act_pool_kernel(%arg0: i32, %arg1: memref<8x304xbf16, #tpu.memory_space<vmem>>, %arg2: memref<304x128xbf16, #tpu.memory_space<vmem>>, %arg3: memref<128x128xf32, #tpu.memory_space<vmem>>, %arg4: memref<1x128xf32, #tpu.memory_space<vmem>>, %arg5: memref<1x128xf32, #tpu.memory_space<vmem>>, %arg6: memref<8x128xbf16, #tpu.memory_space<vmem>>) attributes {dimension_semantics = [#tpu.dimension_semantics<arbitrary>], iteration_bounds = array<i64: 1>, scalar_prefetch = 0 : i64, scratch_operands = 0 : i64, tpu.core_type = #tpu.core_type<tc>, window_params = [{pipeline_mode = #tpu.pipeline_mode<synchronous>, transform_indices = @transform_0, window_bounds = array<i64: 8, 304>}, {pipeline_mode = #tpu.pipeline_mode<synchronous>, transform_indices = @transform_1, window_bounds = array<i64: 304, 128>}, {pipeline_mode = #tpu.pipeline_mode<synchronous>, transform_indices = @transform_2, window_bounds = array<i64: 128, 128>}, {pipeline_mode = #tpu.pipeline_mode<synchronous>, transform_indices = @transform_3, window_bounds = array<i64: 1, 128>}, {pipeline_mode = #tpu.pipeline_mode<synchronous>, transform_indices = @transform_4, window_bounds = array<i64: 1, 128>}, {pipeline_mode = #tpu.pipeline_mode<synchronous>, transform_indices = @transform_5, window_bounds = array<i64: 8, 128>}]} {
    %c0 = arith.constant 0 : index
    %c0_0 = arith.constant 0 : index
    %0 = vector.load %arg1[%c0, %c0_0] : memref<8x304xbf16, #tpu.memory_space<vmem>>, vector<8x304xbf16>
    %c0_1 = arith.constant 0 : index
    %c0_2 = arith.constant 0 : index
    %1 = vector.load %arg2[%c0_1, %c0_2] : memref<304x128xbf16, #tpu.memory_space<vmem>>, vector<304x128xbf16>
    %cst = arith.constant dense<0.000000e+00> : vector<8x128xf32>
    %2 = tpu.matmul %0, %1, %cst {dimension_numbers = #tpu.dot_dimension_numbers<[1], [0], [0], [1], [0, 0, 1, 1], [], []>} : vector<8x304xbf16>, vector<304x128xbf16>, vector<8x128xf32> -> vector<8x128xf32>
    %cst_3 = arith.constant dense<0.000000e+00> : vector<128xf32>
    %3 = vector.multi_reduction <add>, %2, %cst_3 [0] : vector<8x128xf32> to vector<128xf32>
    %4 = vector.shape_cast %3 : vector<128xf32> to vector<1x128xf32>
    %5 = arith.mulf %2, %2 : vector<8x128xf32>
    %cst_4 = arith.constant dense<0.000000e+00> : vector<128xf32>
    %6 = vector.multi_reduction <add>, %5, %cst_4 [0] : vector<8x128xf32> to vector<128xf32>
    %7 = vector.shape_cast %6 : vector<128xf32> to vector<1x128xf32>
    %8 = tpu.concatenate %4, %7 in 0 : vector<1x128xf32>, vector<1x128xf32> -> vector<2x128xf32>
    %c0_5 = arith.constant 0 : index
    %c0_6 = arith.constant 0 : index
    %9 = vector.load %arg3[%c0_5, %c0_6] : memref<128x128xf32, #tpu.memory_space<vmem>>, vector<128x128xf32>
    %cst_7 = arith.constant dense<0.000000e+00> : vector<2x128xf32>
    %10 = tpu.matmul %8, %9, %cst_7 {dimension_numbers = #tpu.dot_dimension_numbers<[1], [0], [0], [1], [0, 0, 1, 1], [], []>} : vector<2x128xf32>, vector<128x128xf32>, vector<2x128xf32> -> vector<2x128xf32>
    %11 = vector.extract_strided_slice %10 {offsets = [0, 0], sizes = [1, 128], strides = [1, 1]} : vector<2x128xf32> to vector<1x128xf32>
    %12 = vector.extract_strided_slice %10 {offsets = [1, 0], sizes = [1, 128], strides = [1, 1]} : vector<2x128xf32> to vector<1x128xf32>
    %c0_8 = arith.constant 0 : index
    %c0_9 = arith.constant 0 : index
    %13 = vector.load %arg4[%c0_8, %c0_9] : memref<1x128xf32, #tpu.memory_space<vmem>>, vector<1x128xf32>
    %c0_10 = arith.constant 0 : index
    %c0_11 = arith.constant 0 : index
    %14 = vector.load %arg5[%c0_10, %c0_11] : memref<1x128xf32, #tpu.memory_space<vmem>>, vector<1x128xf32>
    %cst_12 = arith.constant 3.125000e-02 : f32
    %15 = vector.broadcast %cst_12 : f32 to vector<1x128xf32>
    %16 = arith.mulf %11, %15 : vector<1x128xf32>
    %cst_13 = arith.constant 3.125000e-02 : f32
    %17 = vector.broadcast %cst_13 : f32 to vector<1x128xf32>
    %18 = arith.mulf %12, %17 : vector<1x128xf32>
    %19 = arith.mulf %16, %16 : vector<1x128xf32>
    %20 = arith.subf %18, %19 : vector<1x128xf32>
    %cst_14 = arith.constant 0.000000e+00 : f32
    %21 = vector.broadcast %cst_14 : f32 to vector<1x128xf32>
    %22 = arith.maximumf %20, %21 : vector<1x128xf32>
    %cst_15 = arith.constant 9.99999974E-6 : f32
    %23 = vector.broadcast %cst_15 : f32 to vector<1x128xf32>
    %24 = arith.addf %22, %23 : vector<1x128xf32>
    %25 = math.rsqrt %24 : vector<1x128xf32>
    %26 = arith.mulf %13, %25 : vector<1x128xf32>
    %27 = arith.mulf %16, %26 : vector<1x128xf32>
    %28 = arith.subf %14, %27 : vector<1x128xf32>
    %29 = vector.broadcast %26 : vector<1x128xf32> to vector<8x128xf32>
    %30 = arith.mulf %2, %29 : vector<8x128xf32>
    %31 = vector.broadcast %28 : vector<1x128xf32> to vector<8x128xf32>
    %32 = arith.addf %30, %31 : vector<8x128xf32>
    %cst_16 = arith.constant 0.000000e+00 : f32
    %33 = vector.broadcast %cst_16 : f32 to vector<8x128xf32>
    %34 = arith.maximumf %32, %33 : vector<8x128xf32>
    %35 = arith.truncf %34 : vector<8x128xf32> to vector<8x128xbf16>
    %c0_17 = arith.constant 0 : index
    %c0_18 = arith.constant 0 : index
    %36 = vector.load %arg6[%c0_17, %c0_18] : memref<8x128xbf16, #tpu.memory_space<vmem>>, vector<8x128xbf16>
    tpu.vector_store %arg6[%c0_17, %c0_18], %35 {strides = array<i32>} : memref<8x128xbf16, #tpu.memory_space<vmem>>, vector<8x128xbf16>,
    return
  }
  func.func @transform_0(%arg0: i32) -> (i32, i32) {
    %c0_i32 = arith.constant 0 : i32
    %c0_i32_0 = arith.constant 0 : i32
    %c0_i32_1 = arith.constant 0 : i32
    return %c0_i32, %c0_i32_0 : i32, i32
  }
  func.func @transform_1(%arg0: i32) -> (i32, i32) {
    %c0_i32 = arith.constant 0 : i32
    %c0_i32_0 = arith.constant 0 : i32
    %c0_i32_1 = arith.constant 0 : i32
    return %c0_i32, %c0_i32_0 : i32, i32
  }
  func.func @transform_2(%arg0: i32) -> (i32, i32) {
    %c0_i32 = arith.constant 0 : i32
    %c0_i32_0 = arith.constant 0 : i32
    %c0_i32_1 = arith.constant 0 : i32
    return %c0_i32, %c0_i32_0 : i32, i32
  }
  func.func @transform_3(%arg0: i32) -> (i32, i32) {
    %c0_i32 = arith.constant 0 : i32
    %c0_i32_0 = arith.constant 0 : i32
    %c0_i32_1 = arith.constant 0 : i32
    return %c0_i32, %c0_i32_0 : i32, i32
  }
  func.func @transform_4(%arg0: i32) -> (i32, i32) {
    %c0_i32 = arith.constant 0 : i32
    %c0_i32_0 = arith.constant 0 : i32
    %c0_i32_1 = arith.constant 0 : i32
    return %c0_i32, %c0_i32_0 : i32, i32
  }
  func.func @transform_5(%arg0: i32) -> (i32, i32) {
    %c0_i32 = arith.constant 0 : i32
    %c0_i32_0 = arith.constant 0 : i32
    %c0_i32_1 = arith.constant 0 : i32
    return %c0_i32, %c0_i32_0 : i32, i32
  }
}

module attributes {stable_mosaic.version = 11 : i64} {
  func.func @_fused_bn_act_pool_kernel(%arg0: i32, %arg1: memref<32x432xbf16, #tpu.memory_space<vmem>>, %arg2: memref<432x128xbf16, #tpu.memory_space<vmem>>, %arg3: memref<128x128xf32, #tpu.memory_space<vmem>>, %arg4: memref<1x128xf32, #tpu.memory_space<vmem>>, %arg5: memref<1x128xf32, #tpu.memory_space<vmem>>, %arg6: memref<32x128xbf16, #tpu.memory_space<vmem>>) attributes {dimension_semantics = [#tpu.dimension_semantics<arbitrary>], iteration_bounds = array<i64: 1>, scalar_prefetch = 0 : i64, scratch_operands = 0 : i64, tpu.core_type = #tpu.core_type<tc>, window_params = [{pipeline_mode = #tpu.pipeline_mode<synchronous>, transform_indices = @transform_0, window_bounds = array<i64: 32, 432>}, {pipeline_mode = #tpu.pipeline_mode<synchronous>, transform_indices = @transform_1, window_bounds = array<i64: 432, 128>}, {pipeline_mode = #tpu.pipeline_mode<synchronous>, transform_indices = @transform_2, window_bounds = array<i64: 128, 128>}, {pipeline_mode = #tpu.pipeline_mode<synchronous>, transform_indices = @transform_3, window_bounds = array<i64: 1, 128>}, {pipeline_mode = #tpu.pipeline_mode<synchronous>, transform_indices = @transform_4, window_bounds = array<i64: 1, 128>}, {pipeline_mode = #tpu.pipeline_mode<synchronous>, transform_indices = @transform_5, window_bounds = array<i64: 32, 128>}]} {
    %c0 = arith.constant 0 : index
    %c0_0 = arith.constant 0 : index
    %0 = vector.load %arg1[%c0, %c0_0] : memref<32x432xbf16, #tpu.memory_space<vmem>>, vector<32x432xbf16>
    %c0_1 = arith.constant 0 : index
    %c0_2 = arith.constant 0 : index
    %1 = vector.load %arg2[%c0_1, %c0_2] : memref<432x128xbf16, #tpu.memory_space<vmem>>, vector<432x128xbf16>
    %cst = arith.constant dense<0.000000e+00> : vector<32x128xf32>
    %2 = tpu.matmul %0, %1, %cst {dimension_numbers = #tpu.dot_dimension_numbers<[1], [0], [0], [1], [0, 0, 1, 1], [], []>} : vector<32x432xbf16>, vector<432x128xbf16>, vector<32x128xf32> -> vector<32x128xf32>
    %cst_3 = arith.constant dense<0.000000e+00> : vector<128xf32>
    %3 = vector.multi_reduction <add>, %2, %cst_3 [0] : vector<32x128xf32> to vector<128xf32>
    %4 = vector.shape_cast %3 : vector<128xf32> to vector<1x128xf32>
    %5 = arith.mulf %2, %2 : vector<32x128xf32>
    %cst_4 = arith.constant dense<0.000000e+00> : vector<128xf32>
    %6 = vector.multi_reduction <add>, %5, %cst_4 [0] : vector<32x128xf32> to vector<128xf32>
    %7 = vector.shape_cast %6 : vector<128xf32> to vector<1x128xf32>
    %8 = tpu.concatenate %4, %7 in 0 : vector<1x128xf32>, vector<1x128xf32> -> vector<2x128xf32>
    %c0_5 = arith.constant 0 : index
    %c0_6 = arith.constant 0 : index
    %9 = vector.load %arg3[%c0_5, %c0_6] : memref<128x128xf32, #tpu.memory_space<vmem>>, vector<128x128xf32>
    %cst_7 = arith.constant dense<0.000000e+00> : vector<2x128xf32>
    %10 = tpu.matmul %8, %9, %cst_7 {dimension_numbers = #tpu.dot_dimension_numbers<[1], [0], [0], [1], [0, 0, 1, 1], [], []>} : vector<2x128xf32>, vector<128x128xf32>, vector<2x128xf32> -> vector<2x128xf32>
    %11 = vector.extract_strided_slice %10 {offsets = [0, 0], sizes = [1, 128], strides = [1, 1]} : vector<2x128xf32> to vector<1x128xf32>
    %12 = vector.extract_strided_slice %10 {offsets = [1, 0], sizes = [1, 128], strides = [1, 1]} : vector<2x128xf32> to vector<1x128xf32>
    %c0_8 = arith.constant 0 : index
    %c0_9 = arith.constant 0 : index
    %13 = vector.load %arg4[%c0_8, %c0_9] : memref<1x128xf32, #tpu.memory_space<vmem>>, vector<1x128xf32>
    %c0_10 = arith.constant 0 : index
    %c0_11 = arith.constant 0 : index
    %14 = vector.load %arg5[%c0_10, %c0_11] : memref<1x128xf32, #tpu.memory_space<vmem>>, vector<1x128xf32>
    %cst_12 = arith.constant 7.812500e-03 : f32
    %15 = vector.broadcast %cst_12 : f32 to vector<1x128xf32>
    %16 = arith.mulf %11, %15 : vector<1x128xf32>
    %cst_13 = arith.constant 7.812500e-03 : f32
    %17 = vector.broadcast %cst_13 : f32 to vector<1x128xf32>
    %18 = arith.mulf %12, %17 : vector<1x128xf32>
    %19 = arith.mulf %16, %16 : vector<1x128xf32>
    %20 = arith.subf %18, %19 : vector<1x128xf32>
    %cst_14 = arith.constant 0.000000e+00 : f32
    %21 = vector.broadcast %cst_14 : f32 to vector<1x128xf32>
    %22 = arith.maximumf %20, %21 : vector<1x128xf32>
    %cst_15 = arith.constant 9.99999974E-6 : f32
    %23 = vector.broadcast %cst_15 : f32 to vector<1x128xf32>
    %24 = arith.addf %22, %23 : vector<1x128xf32>
    %25 = math.rsqrt %24 : vector<1x128xf32>
    %26 = arith.mulf %13, %25 : vector<1x128xf32>
    %27 = arith.mulf %16, %26 : vector<1x128xf32>
    %28 = arith.subf %14, %27 : vector<1x128xf32>
    %29 = vector.broadcast %26 : vector<1x128xf32> to vector<32x128xf32>
    %30 = arith.mulf %2, %29 : vector<32x128xf32>
    %31 = vector.broadcast %28 : vector<1x128xf32> to vector<32x128xf32>
    %32 = arith.addf %30, %31 : vector<32x128xf32>
    %cst_16 = arith.constant 0.000000e+00 : f32
    %33 = vector.broadcast %cst_16 : f32 to vector<32x128xf32>
    %34 = arith.maximumf %32, %33 : vector<32x128xf32>
    %35 = arith.truncf %34 : vector<32x128xf32> to vector<32x128xbf16>
    %c0_17 = arith.constant 0 : index
    %c0_18 = arith.constant 0 : index
    %36 = vector.load %arg6[%c0_17, %c0_18] : memref<32x128xbf16, #tpu.memory_space<vmem>>, vector<32x128xbf16>
    tpu.vector_store %arg6[%c0_17, %c0_18], %35 {strides = array<i32>} : memref<32x128xbf16, #tpu.memory_space<vmem>>, vector<32x128xbf16>,
    return
  }
  func.func @transform_0(%arg0: i32) -> (i32, i32) {
    %c0_i32 = arith.constant 0 : i32
    %c0_i32_0 = arith.constant 0 : i32
    %c0_i32_1 = arith.constant 0 : i32
    return %c0_i32, %c0_i32_0 : i32, i32
  }
  func.func @transform_1(%arg0: i32) -> (i32, i32) {
    %c0_i32 = arith.constant 0 : i32
    %c0_i32_0 = arith.constant 0 : i32
    %c0_i32_1 = arith.constant 0 : i32
    return %c0_i32, %c0_i32_0 : i32, i32
  }
  func.func @transform_2(%arg0: i32) -> (i32, i32) {
    %c0_i32 = arith.constant 0 : i32
    %c0_i32_0 = arith.constant 0 : i32
    %c0_i32_1 = arith.constant 0 : i32
    return %c0_i32, %c0_i32_0 : i32, i32
  }
  func.func @transform_3(%arg0: i32) -> (i32, i32) {
    %c0_i32 = arith.constant 0 : i32
    %c0_i32_0 = arith.constant 0 : i32
    %c0_i32_1 = arith.constant 0 : i32
    return %c0_i32, %c0_i32_0 : i32, i32
  }
  func.func @transform_4(%arg0: i32) -> (i32, i32) {
    %c0_i32 = arith.constant 0 : i32
    %c0_i32_0 = arith.constant 0 : i32
    %c0_i32_1 = arith.constant 0 : i32
    return %c0_i32, %c0_i32_0 : i32, i32
  }
  func.func @transform_5(%arg0: i32) -> (i32, i32) {
    %c0_i32 = arith.constant 0 : i32
    %c0_i32_0 = arith.constant 0 : i32
    %c0_i32_1 = arith.constant 0 : i32
    return %c0_i32, %c0_i32_0 : i32, i32
  }
}

module attributes {stable_mosaic.version = 11 : i64} {
  func.func @_matmul_bias_act_kernel(%arg0: i32, %arg1: memref<128x144xbf16, #tpu.memory_space<vmem>>, %arg2: memref<144x128xbf16, #tpu.memory_space<vmem>>, %arg3: memref<1x128xf32, #tpu.memory_space<vmem>>, %arg4: memref<128x128xf32, #tpu.memory_space<vmem>>) attributes {dimension_semantics = [#tpu.dimension_semantics<parallel>], iteration_bounds = array<i64: 1>, scalar_prefetch = 0 : i64, scratch_operands = 0 : i64, tpu.core_type = #tpu.core_type<tc>, window_params = [{transform_indices = @transform_0, window_bounds = array<i64: 128, 144>}, {pipeline_mode = #tpu.pipeline_mode<synchronous>, transform_indices = @transform_1, window_bounds = array<i64: 144, 128>}, {pipeline_mode = #tpu.pipeline_mode<synchronous>, transform_indices = @transform_2, window_bounds = array<i64: 1, 128>}, {transform_indices = @transform_3, window_bounds = array<i64: 128, 128>}]} {
    %c0 = arith.constant 0 : index
    %c0_0 = arith.constant 0 : index
    %0 = vector.load %arg1[%c0, %c0_0] : memref<128x144xbf16, #tpu.memory_space<vmem>>, vector<128x144xbf16>
    %c0_1 = arith.constant 0 : index
    %c0_2 = arith.constant 0 : index
    %1 = vector.load %arg2[%c0_1, %c0_2] : memref<144x128xbf16, #tpu.memory_space<vmem>>, vector<144x128xbf16>
    %cst = arith.constant dense<0.000000e+00> : vector<128x128xf32>
    %2 = tpu.matmul %0, %1, %cst {dimension_numbers = #tpu.dot_dimension_numbers<[1], [0], [0], [1], [0, 0, 1, 1], [], []>} : vector<128x144xbf16>, vector<144x128xbf16>, vector<128x128xf32> -> vector<128x128xf32>
    %c0_3 = arith.constant 0 : index
    %c0_4 = arith.constant 0 : index
    %3 = vector.load %arg3[%c0_3, %c0_4] : memref<1x128xf32, #tpu.memory_space<vmem>>, vector<1x128xf32>
    %4 = vector.broadcast %3 : vector<1x128xf32> to vector<128x128xf32>
    %5 = arith.addf %2, %4 : vector<128x128xf32>
    %6 = math.tanh %5 : vector<128x128xf32>
    %c0_5 = arith.constant 0 : index
    %c0_6 = arith.constant 0 : index
    %7 = vector.load %arg4[%c0_5, %c0_6] : memref<128x128xf32, #tpu.memory_space<vmem>>, vector<128x128xf32>
    tpu.vector_store %arg4[%c0_5, %c0_6], %6 {strides = array<i32>} : memref<128x128xf32, #tpu.memory_space<vmem>>, vector<128x128xf32>,
    return
  }
  func.func @transform_0(%arg0: i32) -> (i32, i32) {
    %c0_i32 = arith.constant 0 : i32
    %c0_i32_0 = arith.constant 0 : i32
    return %arg0, %c0_i32 : i32, i32
  }
  func.func @transform_1(%arg0: i32) -> (i32, i32) {
    %c0_i32 = arith.constant 0 : i32
    %c0_i32_0 = arith.constant 0 : i32
    %c0_i32_1 = arith.constant 0 : i32
    return %c0_i32, %c0_i32_0 : i32, i32
  }
  func.func @transform_2(%arg0: i32) -> (i32, i32) {
    %c0_i32 = arith.constant 0 : i32
    %c0_i32_0 = arith.constant 0 : i32
    %c0_i32_1 = arith.constant 0 : i32
    return %c0_i32, %c0_i32_0 : i32, i32
  }
  func.func @transform_3(%arg0: i32) -> (i32, i32) {
    %c0_i32 = arith.constant 0 : i32
    %c0_i32_0 = arith.constant 0 : i32
    return %arg0, %c0_i32 : i32, i32
  }
}

</mosaic_0001>

<bundles_post_ra>
// kernel: _lambda_.6
= control target key start
LH: loop header
LB: loop body
LE: loop exit
PB: predicated region body
PF: predicated region fallthrough
CT: control target
= control target key end

     0   :  { %vm98_vm0 = vcmask 392192   ;;  %s824_s1 = inlined_call_operand.vmem [shape: bf16[48,128], index: 1, kind: input, shape index: {}]   ;;  %s825_s0 = inlined_call_operand.vmem [shape: bf16[128,48], index: 0, kind: input, shape index: {}]   ;;  %s826_s2 = inlined_call_operand.vmem [shape: f32[1,128], index: 2, kind: input, shape index: {}]   ;;  %s827_s3 = inlined_call_operand.vmem [shape: f32[1,128], index: 3, kind: input, shape index: {}]   ;;  %s828_s4 = inlined_call_operand.vmem [shape: bf16[128,128], index: 4, kind: output, shape index: {}]  }
   0x1   :  { %v603_v0 = vld [vmem:[%s824_s1] sm:$0xff]   ;;  %v604_v1 = vld [vmem:[%s824_s1 + $0x8] sm:$0xff]   ;;  %v605_v3 = vld [vmem:[%s824_s1 + $0x10] sm:$0xff]  }
   0x2   :  { %575 = vmatprep.subr.bf16.mxu0 %v603_v0  ;;  %597 = vmatprep.subr.bf16.mxu1 %v603_v0  ;;  %v606_v2 = vld [vmem:[%s825_s0] sm:$0xff]   ;;  %v607_v5 = vld [vmem:[%s825_s0 + $0x8] sm:$0xff]   ;;  %v608_v7 = vld [vmem:[%s825_s0 + $0x10] sm:$0xff]  }
   0x3   :  { %576 = vmatpush3.bf16.msra.mxu0 %v603_v0  ;;  %600 = vmatpush3.bf16.msra.mxu1 %v603_v0  ;;  %v610_v4 = vld [vmem:[%s825_s0 + $0x20] sm:$0xff]   ;;  %v611_v6 = vld [vmem:[%s825_s0 + $0x28] sm:$0xff]   ;;  %v612_v8 = vld [vmem:[%s825_s0 + $0x30] sm:$0xff]  }
   0x4   :  { %577 = vmatprep.subr.bf16.mxu0 %v604_v1  ;;  %598 = vmatprep.subr.bf16.mxu1 %v604_v1  ;;  %v609_v9 = vld [vmem:[%s825_s0 + $0x18] sm:$0xff]  }
   0x5   :  { %581 = vmatprep.mubr.msk.bf16.mxu0 %vm98_vm0, %v606_v2  ;;  %589 = vmatprep.mubr.msk.bf16.mxu1 %vm98_vm0, %v610_v4  ;;  %v613_v10 = vld [vmem:[%s825_s0 + $0x38] sm:$0xff]  }
   0x7   :  { %578 = vmatpush3.bf16.msra.mxu0 %v604_v1  ;;  %601 = vmatpush3.bf16.msra.mxu1 %v604_v1 }
   0x8   :  { %579 = vmatprep.subr.bf16.mxu0 %v605_v3  ;;  %599 = vmatprep.subr.bf16.mxu1 %v605_v3 }
   0xb   :  { %580 = vmatpush3.bf16.msra.mxu0 %v605_v3  ;;  %602 = vmatpush3.bf16.msra.mxu1 %v605_v3 }
   0xe   :  { %582 = vmatmul.mubr.msk.bf16.vlgmr.msra.gmra.mrb[0].mxu0 %vm98_vm0, %v607_v5  ;;  %590 = vmatmul.mubr.msk.bf16.vlgmr.msra.gmra.mrb[0].mxu1 %vm98_vm0, %v611_v6 }
   0xf   :  { %585 = vmatprep.mubr.msk.bf16.mxu0 %vm98_vm0, %v608_v7  ;;  %593 = vmatprep.mubr.msk.bf16.mxu1 %vm98_vm0, %v612_v8 }
  0x16   :  { %586 = vmatmul.mubr.msk.bf16.gmra.mrb[4].mxu0 %vm98_vm0, %v609_v9  ;;  %594 = vmatmul.mubr.msk.bf16.gmra.mrb[4].mxu1 %vm98_vm0, %v613_v10 }
  0xe1   :  { %v682_v11 = vpop.f32.mrb[0].mxu0  ;;  %v684_v12 = vpop.f32.mrb[0].mxu1 }
  0xe2   :  { %v686_v13 = vpop.f32.mrb[1].mxu0  ;;  %v688_v14 = vpop.f32.mrb[1].mxu1  ;;  %v243_v22 = vmul.f32 %v682_v11, %v682_v11  ;;  %v251_v54 = vmul.f32 %v684_v12, %v684_v12 }
  0xe3   :  { %v690_v15 = vpop.f32.mrb[2].mxu0  ;;  %v692_v16 = vpop.f32.mrb[2].mxu1  ;;  %v241_v19 = vmul.f32 %v686_v13, %v686_v13  ;;  %v249_v48 = vmul.f32 %v688_v14, %v688_v14 }
  0xe4   :  { %v694_v17 = vpop.f32.mrb[3].mxu0  ;;  %v696_v18 = vpop.f32.mrb[3].mxu1  ;;  %v244_v25 = vmul.f32 %v690_v15, %v690_v15  ;;  %v252_v57 = vmul.f32 %v692_v16, %v692_v16 }
  0xe5   :  { %v220_v20 = vadd.f32 %v694_v17, %v686_v13  ;;  %v242_v21 = vmul.f32 %v694_v17, %v694_v17  ;;  %v250_v53 = vmul.f32 %v696_v18, %v696_v18 }
  0xe7   :  { %v221_v23 = vadd.f32 %v682_v11, %v220_v20  ;;  %v257_v24 = vadd.f32 %v242_v21, %v241_v19 }
  0xe9   :  { %v258_v26 = vadd.f32 %v257_v24, %v243_v22  ;;  %v709_v27 = vpop.f32.mrb[4].mxu0  ;;  %v222_v28 = vadd.f32 %v690_v15, %v221_v23  ;;  %v712_v29 = vpop.f32.mrb[4].mxu1 }
  0xea   :  { %v714_v30 = vpop.f32.mrb[5].mxu0  ;;  %v716_v31 = vpop.f32.mrb[5].mxu1  ;;  %v247_v42 = vmul.f32 %v709_v27, %v709_v27  ;;  %v255_v2 = vmul.f32 %v712_v29, %v712_v29 }
  0xeb   :  { %v223_v32 = vadd.f32 %v222_v28, %v714_v30  ;;  %v245_v33 = vmul.f32 %v714_v30, %v714_v30  ;;  %v259_v34 = vadd.f32 %v258_v26, %v244_v25  ;;  %v721_v35 = vpop.f32.mrb[6].mxu0  ;;  %v723_v36 = vpop.f32.mrb[6].mxu1  ;;  %v253_v60 = vmul.f32 %v716_v31, %v716_v31 }
  0xec   :  { %v725_v37 = vpop.f32.mrb[7].mxu0  ;;  %v727_v38 = vpop.f32.mrb[7].mxu1  ;;  %v248_v45 = vmul.f32 %v721_v35, %v721_v35  ;;  %v256_v5 = vmul.f32 %v723_v36, %v723_v36 }
  0xed   :  { %v260_v39 = vadd.f32 %v259_v34, %v245_v33  ;;  %v224_v40 = vadd.f32 %v223_v32, %v725_v37  ;;  %v246_v41 = vmul.f32 %v725_v37, %v725_v37  ;;  %v254_v1 = vmul.f32 %v727_v38, %v727_v38 }
  0xef   :  { %v225_v43 = vadd.f32 %v709_v27, %v224_v40  ;;  %v261_v44 = vadd.f32 %v260_v39, %v246_v41 }
  0xf1   :  { %v262_v46 = vadd.f32 %v261_v44, %v247_v42  ;;  %v226_v47 = vadd.f32 %v721_v35, %v225_v43  ;;  %v291_v43 = vlaneseq }
  0xf3   :  { %v227_v49 = vadd.f32 %v226_v47, %v688_v14  ;;  %v263_v50 = vadd.f32 %v262_v46, %v248_v45  ;;  %v292_v44 = vshrl.u32 %v291_v43, 7  ;;  %v278_v45 = vld [vmem:[%s826_s2] sm:$0x1] }
  0xf5   :  { %v264_v51 = vadd.f32 %v263_v50, %v249_v48  ;;  %v228_v52 = vadd.f32 %v227_v49, %v696_v18  ;;  %v293_v46 = vsub.s32 0, %v292_v44  ;;  %v279_v49 = vld [vmem:[%s827_s3] sm:$0x1] }
  0xf7   :  { %v229_v55 = vadd.f32 %v684_v12, %v228_v52  ;;  %v265_v56 = vadd.f32 %v264_v51, %v250_v53 }
  0xf9   :  { %v266_v58 = vadd.f32 %v265_v56, %v251_v54  ;;  %v230_v59 = vadd.f32 %v692_v16, %v229_v55 }
  0xfb   :  { %v231_v61 = vadd.f32 %v230_v59, %v716_v31  ;;  %v267_v62 = vadd.f32 %v266_v58, %v252_v57 }
  0xfd   :  { %v268_v63 = vadd.f32 %v267_v62, %v253_v60  ;;  %v232_v0 = vadd.f32 %v231_v61, %v727_v38 }
  0xff   :  { %v233_v3 = vadd.f32 %v712_v29, %v232_v0  ;;  %v269_v4 = vadd.f32 %v268_v63, %v254_v1 }
 0x101   :  { %v234_v6 = vadd.f32 %v723_v36, %v233_v3  ;;  %v270_v7 = vadd.f32 %v269_v4, %v255_v2 }
 0x103   :  { %v235_v8 = vrot.slane %v234_v6, 4  ;;  %v271_v9 = vadd.f32 %v270_v7, %v256_v5 }
 0x105   :  { %v236_v10 = vadd.f32 %v235_v8, %v234_v6  ;;  %v272_v19 = vrot.slane %v271_v9, 4 }
 0x107   :  { %v237_v20 = vrot.slane %v236_v10, 2  ;;  %v273_v21 = vadd.f32 %v272_v19, %v271_v9 }
 0x109   :  { %v238_v22 = vadd.f32 %v237_v20, %v236_v10  ;;  %v274_v23 = vrot.slane %v273_v21, 2 }
 0x10b   :  { %v239_v24 = vrot.slane %v238_v22, 1  ;;  %v275_v25 = vadd.f32 %v274_v23, %v273_v21 }
 0x10d   :  { %v240_v26 = vadd.f32 %v239_v24, %v238_v22  ;;  %v276_v28 = vrot.slane %v275_v25, 1 }
 0x10f   :  { %v277_v32 = vadd.f32 %v276_v28, %v275_v25  ;;  %v280_v33 = vmul.f32 0.0078125, %v240_v26 }
 0x111   :  { %v281_v34 = vmul.f32 0.0078125, %v277_v32  ;;  %v282_v39 = vmul.f32 %v280_v33, %v280_v33 }
 0x113   :  { %v283_v40 = vsub.f32 %v281_v34, %v282_v39 }
 0x115   :  { %v284_v41 = vmax.f32 %v283_v40, 0.0 }
 0x117   :  { %v285_v42 = vadd.f32 1e-05, %v284_v41 }
 0x119   :  { %614 = vrsqrt.f32 %v285_v42 }
 0x123   :  { %v615_v47 = vpop.eup %614 }
 0x124   :  { %v287_v48 = vmul.f32 %v615_v47, %v278_v45 }
 0x126   :  { %v288_v50 = vmul.f32 %v287_v48, %v280_v33  ;;  %v294_v51 = vrot.slane %v287_v48, %v293_v46 }
 0x128   :  { %v289_v52 = vsub.f32 %v279_v49, %v288_v50  ;;  %v296_v53 = vmul.f32 %v294_v51, %v686_v13  ;;  %v297_v54 = vmul.f32 %v294_v51, %v694_v17  ;;  %v298_v55 = vmul.f32 %v682_v11, %v294_v51 }
 0x129   :  { %v299_v56 = vmul.f32 %v690_v15, %v294_v51  ;;  %v300_v57 = vmul.f32 %v294_v51, %v714_v30  ;;  %v301_v58 = vmul.f32 %v294_v51, %v725_v37  ;;  %v302_v59 = vmul.f32 %v709_v27, %v294_v51 }
 0x12a   :  { %v303_v60 = vmul.f32 %v721_v35, %v294_v51  ;;  %v304_v61 = vmul.f32 %v294_v51, %v688_v14  ;;  %v305_v62 = vmul.f32 %v294_v51, %v696_v18  ;;  %v306_v13 = vmul.f32 %v684_v12, %v294_v51 }
 0x12b   :  { %v307_v17 = vmul.f32 %v692_v16, %v294_v51  ;;  %v308_v11 = vmul.f32 %v294_v51, %v716_v31  ;;  %v309_v15 = vmul.f32 %v294_v51, %v727_v38  ;;  %v310_v30 = vmul.f32 %v712_v29, %v294_v51 }
 0x12c   :  { %v311_v37 = vmul.f32 %v723_v36, %v294_v51  ;;  %v316_v63 = vrot.slane %v289_v52, %v293_v46 }
 0x12e   :  { %v318_v27 = vadd.f32 %v316_v63, %v296_v53  ;;  %v319_v0 = vadd.f32 %v316_v63, %v297_v54  ;;  %v320_v35 = vadd.f32 %v316_v63, %v298_v55  ;;  %v321_v1 = vadd.f32 %v316_v63, %v299_v56 }
 0x12f   :  { %v322_v14 = vadd.f32 %v316_v63, %v300_v57  ;;  %v323_v2 = vadd.f32 %v316_v63, %v301_v58  ;;  %v324_v18 = vadd.f32 %v316_v63, %v302_v59  ;;  %v325_v3 = vadd.f32 %v316_v63, %v303_v60 }
 0x130   :  { %v326_v12 = vadd.f32 %v316_v63, %v304_v61  ;;  %v327_v4 = vadd.f32 %v316_v63, %v305_v62  ;;  %v328_v16 = vadd.f32 %v316_v63, %v306_v13  ;;  %v329_v5 = vadd.f32 %v316_v63, %v307_v17 }
 0x131   :  { %v330_v31 = vadd.f32 %v316_v63, %v308_v11  ;;  %v331_v6 = vadd.f32 %v316_v63, %v309_v15  ;;  %v332_v38 = vadd.f32 %v316_v63, %v310_v30  ;;  %v333_v7 = vadd.f32 %v316_v63, %v311_v37 }
 0x132   :  { %vm334_vm1 = vcmp.ge.f32.partialorder %v318_v27, 0.0  ;;  %vm335_vm2 = vcmp.ge.f32.partialorder %v319_v0, 0.0  ;;  %vm336_vm3 = vcmp.ge.f32.partialorder %v320_v35, 0.0  ;;  %vm337_vm4 = vcmp.ge.f32.partialorder %v321_v1, 0.0 }
 0x133   :  { %vm338_vm5 = vcmp.ge.f32.partialorder %v322_v14, 0.0  ;;  %vm339_vm6 = vcmp.ge.f32.partialorder %v323_v2, 0.0  ;;  %vm340_vm7 = vcmp.ge.f32.partialorder %v324_v18, 0.0  ;;  %vm341_vm8 = vcmp.ge.f32.partialorder %v325_v3, 0.0 }
 0x134   :  { %vm342_vm9 = vcmp.ge.f32.partialorder %v326_v12, 0.0  ;;  %vm343_vm10 = vcmp.ge.f32.partialorder %v327_v4, 0.0  ;;  %vm344_vm11 = vcmp.ge.f32.partialorder %v328_v16, 0.0  ;;  %vm345_vm12 = vcmp.ge.f32.partialorder %v329_v5, 0.0 }
 0x135   :  { %vm346_vm13 = vcmp.ge.f32.partialorder %v330_v31, 0.0  ;;  %vm347_vm14 = vcmp.ge.f32.partialorder %v331_v6, 0.0  ;;  %vm348_vm15 = vcmp.ge.f32.partialorder %v332_v38, 0.0  ;;  %vm349_vm0 = vcmp.ge.f32.partialorder %v333_v7, 0.0 }
 0x136   :  { %v350_v29 = vmul.f32 0.2, %v318_v27  ;;  %v351_v36 = vmul.f32 0.2, %v319_v0  ;;  %v352_v8 = vmul.f32 0.2, %v320_v35 }
 0x137   :  { %v353_v9 = vmul.f32 0.2, %v321_v1  ;;  %v354_v10 = vmul.f32 0.2, %v322_v14  ;;  %v355_v19 = vmul.f32 0.2, %v323_v2 }
 0x138   :  { %v356_v20 = vmul.f32 0.2, %v324_v18  ;;  %v357_v21 = vmul.f32 0.2, %v325_v3  ;;  %v358_v22 = vmul.f32 0.2, %v326_v12  ;;  %v366_v23 = vsel %vm334_vm1, %v318_v27, %v350_v29 }
 0x139   :  { %v359_v24 = vmul.f32 0.2, %v327_v4  ;;  %v360_v25 = vmul.f32 0.2, %v328_v16  ;;  %v361_v26 = vmul.f32 0.2, %v329_v5  ;;  %v367_v28 = vsel %vm335_vm2, %v319_v0, %v351_v36 }
 0x13a   :  { %v362_v32 = vmul.f32 0.2, %v330_v31  ;;  %v363_v33 = vmul.f32 0.2, %v331_v6  ;;  %v364_v34 = vmul.f32 0.2, %v332_v38  ;;  %v368_v39 = vsel %vm336_vm3, %v320_v35, %v352_v8 }
 0x13b   :  { %v365_v40 = vmul.f32 0.2, %v333_v7  ;;  %v369_v41 = vsel %vm337_vm4, %v321_v1, %v353_v9  ;;  %v370_v42 = vsel %vm338_vm5, %v322_v14, %v354_v10  ;;  %v371_v43 = vsel %vm339_vm6, %v323_v2, %v355_v19 }
 0x13c   :  { %v372_v44 = vsel %vm340_vm7, %v324_v18, %v356_v20  ;;  %v373_v45 = vsel %vm341_vm8, %v325_v3, %v357_v21  ;;  %v374_v46 = vsel %vm342_vm9, %v326_v12, %v358_v22  ;;  %v375_v47 = vsel %vm343_vm10, %v327_v4, %v359_v24 }
 0x13d   :  { %v376_v48 = vsel %vm344_vm11, %v328_v16, %v360_v25  ;;  %v377_v49 = vsel %vm345_vm12, %v329_v5, %v361_v26  ;;  %v378_v50 = vsel %vm346_vm13, %v330_v31, %v362_v32  ;;  %v379_v51 = vsel %vm347_vm14, %v331_v6, %v363_v33 }
 0x13e   :  { %v380_v52 = vsel %vm348_vm15, %v332_v38, %v364_v34  ;;  %v381_v53 = vsel %vm349_vm0, %v333_v7, %v365_v40  ;;  %v520_v54 = vpack.c.bf16 %v367_v28, %v366_v23  ;;  %v525_v55 = vpack.c.bf16 %v369_v41, %v368_v39 }
 0x13f   :  { %v530_v56 = vpack.c.bf16 %v371_v43, %v370_v42  ;;  %v535_v57 = vpack.c.bf16 %v373_v45, %v372_v44  ;;  %v540_v58 = vpack.c.bf16 %v375_v47, %v374_v46  ;;  %v545_v59 = vpack.c.bf16 %v377_v49, %v376_v48 }
 0x140   :  { %521 = vst [vmem:[%s828_s4] sm:$0xff] %v520_v54   ;;  %557 = vst [vmem:[%s828_s4 + $0x8] sm:$0xff] %v525_v55   ;;  %v550_v60 = vpack.c.bf16 %v379_v51, %v378_v50  ;;  %v555_v61 = vpack.c.bf16 %v381_v53, %v380_v52 }
 0x141   :  { %558 = vst [vmem:[%s828_s4 + $0x10] sm:$0xff] %v530_v56   ;;  %559 = vst [vmem:[%s828_s4 + $0x18] sm:$0xff] %v535_v57  }
 0x142   :  { %560 = vst [vmem:[%s828_s4 + $0x20] sm:$0xff] %v540_v58   ;;  %561 = vst [vmem:[%s828_s4 + $0x28] sm:$0xff] %v545_v59  }
 0x143   :  { %562 = vst [vmem:[%s828_s4 + $0x30] sm:$0xff] %v550_v60   ;;  %563 = vst [vmem:[%s828_s4 + $0x38] sm:$0xff] %v555_v61  }

// kernel: _lambda_.7
= control target key start
LH: loop header
LB: loop body
LE: loop exit
PB: predicated region body
PF: predicated region fallthrough
CT: control target
= control target key end

     0   :  { %v182_v42 = vlaneseq  ;;  %s375_s1 = inlined_call_operand.vmem [shape: bf16[128,128], index: 1, kind: input, shape index: {}]   ;;  %s376_s0 = inlined_call_operand.vmem [shape: bf16[32,128], index: 0, kind: input, shape index: {}]   ;;  %s377_s2 = inlined_call_operand.vmem [shape: f32[1,128], index: 2, kind: input, shape index: {}]   ;;  %s378_s3 = inlined_call_operand.vmem [shape: f32[1,128], index: 3, kind: input, shape index: {}]   ;;  %s379_s4 = inlined_call_operand.vmem [shape: bf16[32,128], index: 4, kind: output, shape index: {}]  }
   0x1   :  { %v296_v0 = vld [vmem:[%s375_s1] sm:$0xff]   ;;  %v297_v1 = vld [vmem:[%s375_s1 + $0x8] sm:$0xff]   ;;  %v298_v2 = vld [vmem:[%s375_s1 + $0x10] sm:$0xff]  }
   0x2   :  { %276 = vmatprep.subr.bf16.mxu0 %v296_v0  ;;  %v299_v3 = vld [vmem:[%s375_s1 + $0x18] sm:$0xff]   ;;  %v304_v4 = vld [vmem:[%s376_s0] sm:$0xff]   ;;  %v301_v6 = vld [vmem:[%s375_s1 + $0x28] sm:$0xff]   ;;  %v183_v43 = vshrl.u32 %v182_v42, 7 }
   0x3   :  { %277 = vmatpush3.bf16.msra.mxu0 %v296_v0  ;;  %292 = vmatprep.mubr.bf16.mxu0 %v304_v4  ;;  %v300_v5 = vld [vmem:[%s375_s1 + $0x20] sm:$0xff]   ;;  %v302_v7 = vld [vmem:[%s375_s1 + $0x30] sm:$0xff]   ;;  %v303_v8 = vld [vmem:[%s375_s1 + $0x38] sm:$0xff]  }
   0x4   :  { %278 = vmatprep.subr.bf16.mxu0 %v297_v1  ;;  %v305_v9 = vld [vmem:[%s376_s0 + $0x8] sm:$0xff]   ;;  %v169_v44 = vld [vmem:[%s377_s2] sm:$0x1]  ;;  %v184_v45 = vsub.s32 0, %v183_v43 }
   0x5   :  { %v170_v48 = vld [vmem:[%s378_s3] sm:$0x1] }
   0x7   :  { %279 = vmatpush3.bf16.msra.mxu0 %v297_v1 }
   0x8   :  { %280 = vmatprep.subr.bf16.mxu0 %v298_v2 }
   0xb   :  { %281 = vmatpush3.bf16.msra.mxu0 %v298_v2 }
   0xc   :  { %282 = vmatprep.subr.bf16.mxu0 %v299_v3 }
   0xf   :  { %283 = vmatpush3.bf16.msra.mxu0 %v299_v3 }
  0x10   :  { %284 = vmatprep.subr.bf16.mxu0 %v300_v5 }
  0x13   :  { %285 = vmatpush3.bf16.msra.mxu0 %v300_v5 }
  0x14   :  { %286 = vmatprep.subr.bf16.mxu0 %v301_v6 }
  0x17   :  { %287 = vmatpush3.bf16.msra.mxu0 %v301_v6 }
  0x18   :  { %288 = vmatprep.subr.bf16.mxu0 %v302_v7 }
  0x1b   :  { %289 = vmatpush3.bf16.msra.mxu0 %v302_v7 }
  0x1c   :  { %290 = vmatprep.subr.bf16.mxu0 %v303_v8 }
  0x1f   :  { %291 = vmatpush3.bf16.msra.mxu0 %v303_v8 }
  0x22   :  { %293 = vmatmul.mubr.bf16.vlgmr.msra.gmra.mrb[0].mxu0 %v305_v9 }
  0xf5   :  { %v294_v10 = vpop.f32.mrb[0].mxu0 }
  0xf6   :  { %v132_v11 = vpop.f32.mrb[1].mxu0  ;;  %v158_v17 = vmul.f32 %v294_v10, %v294_v10 }
  0xf7   :  { %v295_v12 = vpop.f32.mrb[2].mxu0  ;;  %v156_v14 = vmul.f32 %v132_v11, %v132_v11 }
  0xf8   :  { %v135_v13 = vpop.f32.mrb[3].mxu0  ;;  %v159_v20 = vmul.f32 %v295_v12, %v295_v12 }
  0xf9   :  { %v147_v15 = vadd.f32 %v135_v13, %v132_v11  ;;  %v157_v16 = vmul.f32 %v135_v13, %v135_v13 }
  0xfb   :  { %v148_v18 = vadd.f32 %v294_v10, %v147_v15  ;;  %v160_v19 = vadd.f32 %v157_v16, %v156_v14 }
  0xfd   :  { %v149_v21 = vadd.f32 %v295_v12, %v148_v18  ;;  %v161_v22 = vadd.f32 %v160_v19, %v158_v17 }
  0xff   :  { %v150_v23 = vrot.slane %v149_v21, 4  ;;  %v162_v24 = vadd.f32 %v161_v22, %v159_v20 }
 0x101   :  { %v151_v25 = vadd.f32 %v150_v23, %v149_v21  ;;  %v163_v26 = vrot.slane %v162_v24, 4 }
 0x103   :  { %v152_v27 = vrot.slane %v151_v25, 2  ;;  %v164_v28 = vadd.f32 %v163_v26, %v162_v24 }
 0x105   :  { %v153_v29 = vadd.f32 %v152_v27, %v151_v25  ;;  %v165_v30 = vrot.slane %v164_v28, 2 }
 0x107   :  { %v154_v31 = vrot.slane %v153_v29, 1  ;;  %v166_v32 = vadd.f32 %v165_v30, %v164_v28 }
 0x109   :  { %v155_v33 = vadd.f32 %v154_v31, %v153_v29  ;;  %v167_v34 = vrot.slane %v166_v32, 1 }
 0x10b   :  { %v168_v35 = vadd.f32 %v167_v34, %v166_v32  ;;  %v171_v36 = vmul.f32 0.03125, %v155_v33 }
 0x10d   :  { %v172_v37 = vmul.f32 0.03125, %v168_v35  ;;  %v173_v38 = vmul.f32 %v171_v36, %v171_v36 }
 0x10f   :  { %v174_v39 = vsub.f32 %v172_v37, %v173_v38 }
 0x111   :  { %v175_v40 = vmax.f32 %v174_v39, 0.0 }
 0x113   :  { %v176_v41 = vadd.f32 1e-05, %v175_v40 }
 0x115   :  { %306 = vrsqrt.f32 %v176_v41 }
 0x11f   :  { %v307_v46 = vpop.eup %306 }
 0x120   :  { %v178_v47 = vmul.f32 %v307_v46, %v169_v44 }
 0x122   :  { %v179_v49 = vmul.f32 %v178_v47, %v171_v36  ;;  %v185_v50 = vrot.slane %v178_v47, %v184_v45 }
 0x124   :  { %v180_v51 = vsub.f32 %v170_v48, %v179_v49  ;;  %v187_v52 = vmul.f32 %v185_v50, %v132_v11  ;;  %v188_v53 = vmul.f32 %v185_v50, %v135_v13  ;;  %v189_v54 = vmul.f32 %v294_v10, %v185_v50 }
 0x125   :  { %v190_v55 = vmul.f32 %v295_v12, %v185_v50 }
 0x126   :  { %v195_v56 = vrot.slane %v180_v51, %v184_v45 }
 0x128   :  { %v197_v57 = vadd.f32 %v195_v56, %v187_v52  ;;  %v198_v58 = vadd.f32 %v195_v56, %v188_v53  ;;  %v199_v59 = vadd.f32 %v195_v56, %v189_v54  ;;  %v200_v60 = vadd.f32 %v195_v56, %v190_v55 }
 0x12a   :  { %vm201_vm0 = vcmp.ge.f32.partialorder %v197_v57, 0.0  ;;  %vm202_vm1 = vcmp.ge.f32.partialorder %v198_v58, 0.0  ;;  %vm203_vm2 = vcmp.ge.f32.partialorder %v199_v59, 0.0  ;;  %vm204_vm3 = vcmp.ge.f32.partialorder %v200_v60, 0.0 }
 0x12b   :  { %v205_v61 = vmul.f32 0.2, %v197_v57  ;;  %v206_v62 = vmul.f32 0.2, %v198_v58  ;;  %v207_v63 = vmul.f32 0.2, %v199_v59 }
 0x12c   :  { %v208_v0 = vmul.f32 0.2, %v200_v60 }
 0x12d   :  { %v209_v1 = vsel %vm201_vm0, %v197_v57, %v205_v61  ;;  %v210_v2 = vsel %vm202_vm1, %v198_v58, %v206_v62  ;;  %v211_v3 = vsel %vm203_vm2, %v199_v59, %v207_v63 }
 0x12e   :  { %v212_v4 = vsel %vm204_vm3, %v200_v60, %v208_v0  ;;  %v258_v5 = vpack.c.bf16 %v210_v2, %v209_v1 }
 0x12f   :  { %v263_v6 = vpack.c.bf16 %v212_v4, %v211_v3 }
 0x130   :  { %259 = vst [vmem:[%s379_s4] sm:$0xff] %v258_v5  }
 0x131   :  { %265 = vst [vmem:[%s379_s4 + $0x8] sm:$0xff] %v263_v6  }

// kernel: _lambda_.8
= control target key start
LH: loop header
LB: loop body
LE: loop exit
PB: predicated region body
PF: predicated region fallthrough
CT: control target
= control target key end

     0   :  { %v220_v43 = vlaneseq  ;;  %s387_s1 = inlined_call_operand.vmem [shape: bf16[256,128], index: 1, kind: input, shape index: {}]   ;;  %s388_s0 = inlined_call_operand.vmem [shape: bf16[8,256], index: 0, kind: input, shape index: {}]   ;;  %s389_s2 = inlined_call_operand.vmem [shape: f32[1,128], index: 2, kind: input, shape index: {}]   ;;  %s390_s3 = inlined_call_operand.vmem [shape: f32[1,128], index: 3, kind: input, shape index: {}]   ;;  %s391_s4 = inlined_call_operand.vmem [shape: bf16[8,128], index: 4, kind: output, shape index: {}]  }
   0x1   :  { %v282_v0 = vld [vmem:[%s387_s1 + $0x40] sm:$0xff]   ;;  %v284_v2 = vld [vmem:[%s387_s1 + $0x48] sm:$0xff]   ;;  %v286_v4 = vld [vmem:[%s387_s1 + $0x50] sm:$0xff]  }
   0x2   :  { %v283_v1 = vld [vmem:[%s387_s1] sm:$0xff]   ;;  %260 = vmatprep.subr.bf16.mxu0 %v282_v0  ;;  %v285_v3 = vld [vmem:[%s387_s1 + $0x8] sm:$0xff]   ;;  %v287_v5 = vld [vmem:[%s387_s1 + $0x10] sm:$0xff]   ;;  %v221_v44 = vshrl.u32 %v220_v43, 7 }
   0x3   :  { %261 = vmatpush3.bf16.msra.mxu0 %v283_v1  ;;  %v288_v6 = vld [vmem:[%s387_s1 + $0x58] sm:$0xff]   ;;  %v290_v8 = vld [vmem:[%s387_s1 + $0x60] sm:$0xff]   ;;  %v292_v10 = vld [vmem:[%s387_s1 + $0x68] sm:$0xff]  }
   0x4   :  { %262 = vmatprep.subr.bf16.mxu0 %v284_v2  ;;  %v289_v7 = vld [vmem:[%s387_s1 + $0x18] sm:$0xff]   ;;  %v291_v9 = vld [vmem:[%s387_s1 + $0x20] sm:$0xff]   ;;  %v293_v13 = vld [vmem:[%s387_s1 + $0x28] sm:$0xff]   ;;  %v222_v46 = vsub.s32 0, %v221_v44 }
   0x5   :  { %v18_v11 = vld [vmem:[%s388_s0] sm:$0xff]  ;;  %v294_v14 = vld [vmem:[%s387_s1 + $0x70] sm:$0xff]   ;;  %v296_v16 = vld [vmem:[%s387_s1 + $0x78] sm:$0xff]  }
   0x6   :  { %v243_v12 = vcombine.high %v18_v11, %v18_v11  ;;  %v295_v15 = vld [vmem:[%s387_s1 + $0x30] sm:$0xff]   ;;  %v297_v17 = vld [vmem:[%s387_s1 + $0x38] sm:$0xff]   ;;  %v242_v18 = vcombine.low %v18_v11, %v18_v11  ;;  %v207_v45 = vld [vmem:[%s389_s2] sm:$0x1] }
   0x7   :  { %263 = vmatpush3.bf16.msra.mxu0 %v285_v3  ;;  %v208_v49 = vld [vmem:[%s390_s3] sm:$0x1] }
   0x8   :  { %264 = vmatprep.subr.bf16.mxu0 %v286_v4  ;;  %186 = vmatprep.mubr.bf16.mxu0 %v243_v12 }
   0xb   :  { %265 = vmatpush3.bf16.msra.mxu0 %v287_v5 }
   0xc   :  { %266 = vmatprep.subr.bf16.mxu0 %v288_v6 }
   0xf   :  { %267 = vmatpush3.bf16.msra.mxu0 %v289_v7 }
  0x10   :  { %268 = vmatprep.subr.bf16.mxu0 %v290_v8 }
  0x13   :  { %269 = vmatpush3.bf16.msra.mxu0 %v291_v9 }
  0x14   :  { %270 = vmatprep.subr.bf16.mxu0 %v292_v10 }
  0x17   :  { %271 = vmatpush3.bf16.msra.mxu0 %v293_v13 }
  0x18   :  { %272 = vmatprep.subr.bf16.mxu0 %v294_v14 }
  0x1b   :  { %273 = vmatpush3.bf16.msra.mxu0 %v295_v15 }
  0x1c   :  { %274 = vmatprep.subr.bf16.mxu0 %v296_v16 }
  0x1f   :  { %275 = vmatpush3.bf16.msra.mxu0 %v297_v17 }
  0x22   :  { %187 = vmatmul.mubr.bf16.vlgmr.msra.gmra.mrb[0].mxu0 %v242_v18 }
  0xf5   :  { %v276_v19 = vpop.f32.mrb[0].mxu0 }
  0xf6   :  { %v277_v20 = vpop.f32.mrb[1].mxu0 }
  0xf7   :  { %v278_v21 = vadd.f32 %v277_v20, %v276_v19  ;;  %v279_v22 = vpop.f32.mrb[2].mxu0 }
  0xf8   :  { %v280_v23 = vpop.f32.mrb[3].mxu0 }
  0xf9   :  { %v194_v24 = vrot.slane %v278_v21, 4  ;;  %v200_v25 = vmul.f32 %v278_v21, %v278_v21 }
  0xfb   :  { %v195_v26 = vadd.f32 %v278_v21, %v194_v24  ;;  %v201_v27 = vrot.slane %v200_v25, 4 }
  0xfd   :  { %v196_v28 = vrot.slane %v195_v26, 2  ;;  %v202_v29 = vadd.f32 %v201_v27, %v200_v25 }
  0xff   :  { %v197_v30 = vadd.f32 %v196_v28, %v195_v26  ;;  %v203_v31 = vrot.slane %v202_v29, 2 }
 0x101   :  { %v198_v32 = vrot.slane %v197_v30, 1  ;;  %v204_v33 = vadd.f32 %v203_v31, %v202_v29 }
 0x103   :  { %v199_v34 = vadd.f32 %v198_v32, %v197_v30  ;;  %v205_v35 = vrot.slane %v204_v33, 1 }
 0x105   :  { %v206_v36 = vadd.f32 %v205_v35, %v204_v33  ;;  %v209_v37 = vmul.f32 0.125, %v199_v34 }
 0x107   :  { %v210_v38 = vmul.f32 0.125, %v206_v36  ;;  %v211_v39 = vmul.f32 %v209_v37, %v209_v37 }
 0x109   :  { %v212_v40 = vsub.f32 %v210_v38, %v211_v39 }
 0x10b   :  { %v213_v41 = vmax.f32 %v212_v40, 0.0 }
 0x10d   :  { %v214_v42 = vadd.f32 1e-05, %v213_v41 }
 0x10f   :  { %300 = vrsqrt.f32 %v214_v42 }
 0x119   :  { %v301_v47 = vpop.eup %300 }
 0x11a   :  { %v216_v48 = vmul.f32 %v301_v47, %v207_v45 }
 0x11c   :  { %v217_v50 = vmul.f32 %v216_v48, %v209_v37  ;;  %v223_v51 = vrot.slane %v216_v48, %v222_v46 }
 0x11e   :  { %v218_v52 = vsub.f32 %v208_v49, %v217_v50  ;;  %v225_v53 = vmul.f32 %v278_v21, %v223_v51 }
 0x120   :  { %v230_v54 = vrot.slane %v218_v52, %v222_v46 }
 0x122   :  { %v232_v55 = vadd.f32 %v230_v54, %v225_v53 }
 0x124   :  { %vm233_vm0 = vcmp.ge.f32.partialorder %v232_v55, 0.0  ;;  %v234_v56 = vmul.f32 0.2, %v232_v55 }
 0x126   :  { %v235_v57 = vsel %vm233_vm0, %v232_v55, %v234_v56 }
 0x127   :  { %v236_v58 = vpack.c.bf16 %v235_v57, %v235_v57 }
 0x129   :  { %237 = vst [vmem:[%s391_s4] sm:$0xf] %v236_v58 }

// kernel: _lambda_.9
= control target key start
LH: loop header
LB: loop body
LE: loop exit
PB: predicated region body
PF: predicated region fallthrough
CT: control target
= control target key end

     0   :  { %v585_v1 = vmov 0.0   ;;  %vm586_vm0 = vmmov 0   ;;  %vm185_vm1 = vcmask 392192   ;;  %v587_v24 = vmov 0.0|0.0   ;;  %s741_s1 = inlined_call_operand.vmem [shape: bf16[304,128], index: 1, kind: input, shape index: {}]   ;;  %s742_s0 = inlined_call_operand.vmem [shape: bf16[8,304], index: 0, kind: input, shape index: {}]   ;;  %s743_s2 = inlined_call_operand.vmem [shape: f32[128,128], index: 2, kind: input, shape index: {}]   ;;  %s744_s3 = inlined_call_operand.vmem [shape: f32[1,128], index: 3, kind: input, shape index: {}]   ;;  %s745_s4 = inlined_call_operand.vmem [shape: f32[1,128], index: 4, kind: input, shape index: {}]   ;;  %s746_s5 = inlined_call_operand.vmem [shape: bf16[8,128], index: 5, kind: output, shape index: {}]  }
   0x1   :  { %v561_v0 = vld [vmem:[%s741_s1 + $0x40] sm:$0xff]   ;;  %488 = vmatprep.subr.bf16.mxu1 %v585_v1  ;;  %494 = vmatprep.mubr.msk.bf16.mxu1 %vm586_vm0, %v585_v1  ;;  %v563_v3 = vld [vmem:[%s741_s1 + $0x48] sm:$0xff]   ;;  %v565_v5 = vld [vmem:[%s741_s1 + $0x50] sm:$0xff]   ;;  %vm282_vm2 = vcmask 1040384  }
   0x2   :  { %v562_v2 = vld [vmem:[%s741_s1] sm:$0xff]   ;;  %445 = vmatprep.subr.bf16.mxu0 %v561_v0  ;;  %v564_v4 = vld [vmem:[%s741_s1 + $0x8] sm:$0xff]   ;;  %v566_v6 = vld [vmem:[%s741_s1 + $0x10] sm:$0xff]  }
   0x3   :  { %446 = vmatpush3.bf16.msra.mxu0 %v562_v2  ;;  %v567_v7 = vld [vmem:[%s741_s1 + $0x58] sm:$0xff]   ;;  %v569_v9 = vld [vmem:[%s741_s1 + $0x60] sm:$0xff]   ;;  %v576_v12 = vld [vmem:[%s741_s1 + $0x88] sm:$0xff]  }
   0x4   :  { %447 = vmatprep.subr.bf16.mxu0 %v563_v3  ;;  %v568_v8 = vld [vmem:[%s741_s1 + $0x18] sm:$0xff]   ;;  %v573_v10 = vld [vmem:[%s741_s1 + $0x80] sm:$0xff]   ;;  %v571_v13 = vld [vmem:[%s741_s1 + $0x68] sm:$0xff]  }
   0x5   :  { %v570_v11 = vld [vmem:[%s741_s1 + $0x20] sm:$0xff]   ;;  %489 = vmatpush3.bf16.msra.mxu1 %v573_v10  ;;  %v579_v14 = vld [vmem:[%s741_s1 + $0x90] sm:$0xff]   ;;  %v572_v15 = vld [vmem:[%s741_s1 + $0x28] sm:$0xff]  }
   0x6   :  { %490 = vmatprep.subr.bf16.mxu1 %v585_v1  ;;  %v21_v16 = vld [vmem:[%s742_s0] sm:$0xff]  ;;  %v574_v17 = vld [vmem:[%s741_s1 + $0x70] sm:$0xff]   ;;  %v285_v20 = vld [vmem:[%s743_s2 + $0x8] sm:$0xff] }
   0x7   :  { %448 = vmatpush3.bf16.msra.mxu0 %v564_v4  ;;  %v423_v18 = vcombine.high %v21_v16, %v21_v16  ;;  %v284_v19 = vld [vmem:[%s743_s2] sm:$0xff]  ;;  %v582_v21 = vld [vmem:[%s742_s0 + $0x8] ss:$0 sps:$4 sm:$0xff]   ;;  %v575_v23 = vld [vmem:[%s741_s1 + $0x30] sm:$0xff]   ;;  %v422_v32 = vcombine.low %v21_v16, %v21_v16 }
   0x8   :  { %449 = vmatprep.subr.bf16.mxu0 %v565_v5  ;;  %v534_v22 = vpack.c.bf16 %v285_v20, %v284_v19  ;;  %v286_v25 = vld [vmem:[%s743_s2 + $0x10] sm:$0xff]  ;;  %v287_v26 = vld [vmem:[%s743_s2 + $0x18] sm:$0xff]  ;;  %v288_v30 = vld [vmem:[%s743_s2 + $0x20] sm:$0xff]  ;;  %v385_v19 = vlaneseq }
   0x9   :  { %491 = vmatpush3.bf16.msra.mxu1 %v576_v12  ;;  %221 = vmatprep.mubr.bf16.mxu0 %v423_v18  ;;  %v577_v27 = vld [vmem:[%s741_s1 + $0x78] sm:$0xff]   ;;  %v537_v28 = vpack.c.bf16 %v287_v26, %v286_v25  ;;  %v289_v31 = vld [vmem:[%s743_s2 + $0x28] sm:$0xff]  ;;  %v290_v34 = vld [vmem:[%s743_s2 + $0x30] sm:$0xff] }
   0xa   :  { %492 = vmatprep.subr.bf16.mxu1 %v585_v1  ;;  %v578_v29 = vld [vmem:[%s741_s1 + $0x38] sm:$0xff]   ;;  %v540_v33 = vpack.c.bf16 %v289_v31, %v288_v30  ;;  %v292_v37 = vld [vmem:[%s743_s2 + $0x40] sm:$0xff]  ;;  %v293_v38 = vld [vmem:[%s743_s2 + $0x48] sm:$0xff] }
   0xb   :  { %450 = vmatpush3.bf16.msra.mxu0 %v566_v6  ;;  %v291_v35 = vld [vmem:[%s743_s2 + $0x38] sm:$0xff]  ;;  %v546_v39 = vpack.c.bf16 %v293_v38, %v292_v37  ;;  %v294_v40 = vld [vmem:[%s743_s2 + $0x50] sm:$0xff]  ;;  %v296_v43 = vld [vmem:[%s743_s2 + $0x60] sm:$0xff] }
   0xc   :  { %451 = vmatprep.subr.bf16.mxu0 %v567_v7  ;;  %v543_v36 = vpack.c.bf16 %v291_v35, %v290_v34  ;;  %v295_v41 = vld [vmem:[%s743_s2 + $0x58] sm:$0xff]  ;;  %v297_v44 = vld [vmem:[%s743_s2 + $0x68] sm:$0xff]  ;;  %v298_v46 = vld [vmem:[%s743_s2 + $0x70] sm:$0xff] }
   0xd   :  { %493 = vmatpush3.bf16.msra.mxu1 %v579_v14  ;;  %v549_v42 = vpack.c.bf16 %v295_v41, %v294_v40  ;;  %v552_v45 = vpack.c.bf16 %v297_v44, %v296_v43  ;;  %v299_v47 = vld [vmem:[%s743_s2 + $0x78] sm:$0xff]  ;;  %v370_v26 = vld [vmem:[%s744_s3] sm:$0x1] }
   0xe   :  { %533 = vmatprep.subr.bf16.mxu1 %v587_v24  ;;  %v555_v48 = vpack.c.bf16 %v299_v47, %v298_v46  ;;  %v371_v30 = vld [vmem:[%s745_s4] sm:$0x1] }
   0xf   :  { %452 = vmatpush3.bf16.msra.mxu0 %v568_v8 }
  0x10   :  { %453 = vmatprep.subr.bf16.mxu0 %v569_v9  ;;  %495 = vmatmul.mubr.msk.bf16.vlgmr.msra.gmra.mrb[0].mxu1 %vm185_vm1, %v582_v21  ;;  %v386_v21 = vshrl.u32 %v385_v19, 7 }
  0x11   :  { %535 = vmatpush3.bf16.msra.mxu1 %v534_v22  ;;  %530 = vmatprep.mubr.msk.f32.mxu1 %vm586_vm0, %v585_v1 }
  0x12   :  { %536 = vmatprep.subr.bf16.mxu1 %v587_v24 }
  0x13   :  { %454 = vmatpush3.bf16.msra.mxu0 %v570_v11 }
  0x14   :  { %455 = vmatprep.subr.bf16.mxu0 %v571_v13 }
  0x15   :  { %538 = vmatpush3.bf16.msra.mxu1 %v537_v28  ;;  %v404_v28 = vsub.s32 0, %v386_v21 }
  0x16   :  { %539 = vmatprep.subr.bf16.mxu1 %v587_v24 }
  0x17   :  { %456 = vmatpush3.bf16.msra.mxu0 %v572_v15 }
  0x18   :  { %457 = vmatprep.subr.bf16.mxu0 %v574_v17  ;;  %v588_v17 = vmov 1966171168  }
  0x19   :  { %541 = vmatpush3.bf16.msra.mxu1 %v540_v33  ;;  %v383_v18 = vunpack.c.l.s4 %v588_v17 }
  0x1a   :  { %542 = vmatprep.subr.bf16.mxu1 %v587_v24 }
  0x1b   :  { %458 = vmatpush3.bf16.msra.mxu0 %v575_v23  ;;  %v384_v20 = vunpack.c.0.s8 %v383_v18 }
  0x1c   :  { %459 = vmatprep.subr.bf16.mxu0 %v577_v27 }
  0x1d   :  { %544 = vmatpush3.bf16.msra.mxu1 %v543_v36  ;;  %v387_v22 = vsub.s32 %v384_v20, %v386_v21 }
  0x1e   :  { %545 = vmatprep.subr.bf16.mxu1 %v587_v24 }
  0x1f   :  { %460 = vmatpush3.bf16.msra.mxu0 %v578_v29 }
  0x21   :  { %547 = vmatpush3.bf16.msra.mxu1 %v546_v39 }
  0x22   :  { %222 = vmatmul.mubr.bf16.vlgmr.msra.gmra.mrb[0].mxu0 %v422_v32  ;;  %548 = vmatprep.subr.bf16.mxu1 %v587_v24 }
  0x25   :  { %550 = vmatpush3.bf16.msra.mxu1 %v549_v42 }
  0x26   :  { %551 = vmatprep.subr.bf16.mxu1 %v587_v24 }
  0x29   :  { %553 = vmatpush3.bf16.msra.mxu1 %v552_v45 }
  0x2a   :  { %554 = vmatprep.subr.bf16.mxu1 %v587_v24 }
  0x2d   :  { %556 = vmatpush3.bf16.msra.mxu1 %v555_v48 }
  0xe3   :  { %v263_v49 = vpop.f32.mrb[0].mxu1 }
  0xe4   :  { %v496_v50 = vpop.f32.mrb[1].mxu1 }
  0xe5   :  { %v266_v51 = vpop.f32.mrb[2].mxu1 }
  0xe6   :  { %v497_v52 = vpop.f32.mrb[3].mxu1 }
  0xf5   :  { %v461_v53 = vpop.f32.mrb[0].mxu0 }
  0xf6   :  { %v462_v54 = vpop.f32.mrb[1].mxu0 }
  0xf7   :  { %v463_v55 = vadd.f32 %v462_v54, %v461_v53  ;;  %v464_v56 = vpop.f32.mrb[2].mxu0 }
  0xf8   :  { %v465_v57 = vpop.f32.mrb[3].mxu0 }
  0xf9   :  { %v264_v58 = vadd.f32 %v463_v55, %v263_v49 }
  0xfb   :  { %v269_v59 = vrot.slane %v264_v58, 4  ;;  %v275_v60 = vmul.f32 %v264_v58, %v264_v58 }
  0xfd   :  { %v270_v61 = vadd.f32 %v269_v59, %v264_v58  ;;  %v276_v62 = vrot.slane %v275_v60, 4 }
  0xff   :  { %v271_v63 = vrot.slane %v270_v61, 2  ;;  %v277_v0 = vadd.f32 %v276_v62, %v275_v60 }
 0x101   :  { %v272_v1 = vadd.f32 %v271_v63, %v270_v61  ;;  %v278_v2 = vrot.slane %v277_v0, 2 }
 0x103   :  { %v273_v3 = vrot.slane %v272_v1, 1  ;;  %v279_v4 = vadd.f32 %v278_v2, %v277_v0 }
 0x105   :  { %v280_v5 = vrot.slane %v279_v4, 1  ;;  %v274_v6 = vadd.f32 %v273_v3, %v272_v1 }
 0x107   :  { %v281_v7 = vadd.f32 %v280_v5, %v279_v4 }
 0x109   :  { %v283_v8 = vsel %vm282_vm2, %v274_v6, %v281_v7 }
 0x10a   :  { %531 = vmatmul.mubr.f32.vlgmr.msra.gmra.mrb[4].mxu1 %v283_v8 }
 0x1dd   :  { %v366_v9 = vpop.f32.mrb[4].mxu1 }
 0x1de   :  { %v372_v10 = vmul.f32 0.03125, %v366_v9  ;;  %v532_v11 = vpop.f32.mrb[5].mxu1 }
 0x1e0   :  { %v373_v12 = vmul.f32 %v372_v10, %v372_v10 }
 0x1e2   :  { %v375_v13 = vrot.slane %v373_v12, 7 }
 0x1e4   :  { %v377_v14 = vsub.f32 %v372_v10, %v375_v13 }
 0x1e6   :  { %v378_v15 = vmax.f32 %v377_v14, 0.0 }
 0x1e8   :  { %v379_v16 = vadd.f32 1e-05, %v378_v15 }
 0x1ea   :  { %583 = vrsqrt.f32 %v379_v16 }
 0x1f4   :  { %v584_v23 = vpop.eup %583 }
 0x1f5   :  { %v388_v24 = vrot.slane %v584_v23, %v387_v22 }
 0x1f7   :  { %v389_v25 = vcombine.high %v388_v24, %v388_v24 }
 0x1f9   :  { %v396_v27 = vrot.slane %v389_v25, %v387_v22 }
 0x1fb   :  { %v398_v29 = vmul.f32 %v396_v27, %v370_v26 }
 0x1fd   :  { %v399_v31 = vmul.f32 %v398_v29, %v372_v10  ;;  %v405_v32 = vrot.slane %v398_v29, %v404_v28 }
 0x1ff   :  { %v400_v33 = vsub.f32 %v371_v30, %v399_v31  ;;  %v407_v34 = vmul.f32 %v405_v32, %v264_v58 }
 0x201   :  { %v412_v35 = vrot.slane %v400_v33, %v404_v28 }
 0x203   :  { %v414_v36 = vadd.f32 %v412_v35, %v407_v34 }
 0x205   :  { %v415_v37 = vmax.f32 %v414_v36, 0.0 }
 0x207   :  { %v416_v38 = vpack.c.bf16 %v415_v37, %v415_v37 }
 0x209   :  { %417 = vst [vmem:[%s746_s5] sm:$0xf] %v416_v38 }

// kernel: _lambda_.10
= control target key start
LH: loop header
LB: loop body
LE: loop exit
PB: predicated region body
PF: predicated region fallthrough
CT: control target
= control target key end

     0   :  { %v783_v0 = vmov 0   ;;  %vm283_vm0 = vcmask 392192   ;;  %v784_v36 = vmov 0.0|0.0   ;;  %vm785_vm1 = vmmov 0   ;;  %s1008_s1 = inlined_call_operand.vmem [shape: bf16[432,128], index: 1, kind: input, shape index: {}]   ;;  %s1009_s0 = inlined_call_operand.vmem [shape: bf16[32,432], index: 0, kind: input, shape index: {}]   ;;  %s1010_s2 = inlined_call_operand.vmem [shape: f32[128,128], index: 2, kind: input, shape index: {}]   ;;  %s1011_s3 = inlined_call_operand.vmem [shape: f32[1,128], index: 3, kind: input, shape index: {}]   ;;  %s1012_s4 = inlined_call_operand.vmem [shape: f32[1,128], index: 4, kind: input, shape index: {}]   ;;  %s1013_s5 = inlined_call_operand.vmem [shape: bf16[32,128], index: 5, kind: output, shape index: {}]  }
   0x1   :  { %339 = vmatprep.subr.bf16.mxu1 %v783_v0  ;;  %v742_v1 = vld [vmem:[%s1008_s1 + $0x80] sm:$0xff]   ;;  %v743_v2 = vld [vmem:[%s1008_s1 + $0x88] sm:$0xff]   ;;  %v746_v5 = vld [vmem:[%s1008_s1 + $0x90] sm:$0xff]   ;;  %v786_v61 = vmov 0.0   ;;  %vm410_vm2 = vcmask 1040384  }
   0x2   :  { %340 = vmatpush1.bf16.msra.mxu1 %v742_v1  ;;  %v744_v3 = vld [vmem:[%s1008_s1 + $0x40] sm:$0xff]   ;;  %v747_v6 = vld [vmem:[%s1008_s1 + $0x48] sm:$0xff]   ;;  %v750_v8 = vld [vmem:[%s1008_s1 + $0x50] sm:$0xff]  }
   0x3   :  { %341 = vmatprep.subr.bf16.mxu1 %v783_v0  ;;  %v745_v4 = vld [vmem:[%s1008_s1] sm:$0xff]   ;;  %633 = vmatprep.subr.bf16.mxu0 %v744_v3  ;;  %v748_v7 = vld [vmem:[%s1008_s1 + $0x8] sm:$0xff]   ;;  %v751_v9 = vld [vmem:[%s1008_s1 + $0x10] sm:$0xff]  }
   0x4   :  { %634 = vmatpush3.bf16.msra.mxu0 %v745_v4  ;;  %v749_v10 = vld [vmem:[%s1008_s1 + $0x98] sm:$0xff]   ;;  %v752_v12 = vld [vmem:[%s1008_s1 + $0xa0] sm:$0xff]   ;;  %v755_v15 = vld [vmem:[%s1008_s1 + $0xa8] sm:$0xff]  }
   0x5   :  { %635 = vmatprep.subr.bf16.mxu0 %v747_v6  ;;  %v753_v11 = vld [vmem:[%s1008_s1 + $0x58] sm:$0xff]   ;;  %v756_v14 = vld [vmem:[%s1008_s1 + $0x60] sm:$0xff]   ;;  %v759_v17 = vld [vmem:[%s1008_s1 + $0x68] sm:$0xff]  }
   0x6   :  { %342 = vmatpush1.bf16.msra.mxu1 %v743_v2  ;;  %v754_v13 = vld [vmem:[%s1008_s1 + $0x18] sm:$0xff]   ;;  %v757_v16 = vld [vmem:[%s1008_s1 + $0x20] sm:$0xff]   ;;  %v758_v18 = vld [vmem:[%s1008_s1 + $0xb0] sm:$0xff]  }
   0x7   :  { %343 = vmatprep.subr.bf16.mxu1 %v783_v0  ;;  %v760_v19 = vld [vmem:[%s1008_s1 + $0x28] sm:$0xff]   ;;  %v762_v20 = vld [vmem:[%s1008_s1 + $0x70] sm:$0xff]   ;;  %v761_v21 = vld [vmem:[%s1008_s1 + $0xb8] sm:$0xff]  }
   0x8   :  { %636 = vmatpush3.bf16.msra.mxu0 %v748_v7  ;;  %v763_v22 = vld [vmem:[%s1008_s1 + $0x30] sm:$0xff]   ;;  %v765_v23 = vld [vmem:[%s1008_s1 + $0x78] sm:$0xff]   ;;  %v764_v27 = vld [vmem:[%s1008_s1 + $0xc0] sm:$0xff]  }
   0x9   :  { %637 = vmatprep.subr.bf16.mxu0 %v750_v8  ;;  %v769_v24 = vld [vmem:[%s1009_s0 + $0x4] ss:$16 sps:$4 sm:$0xff]   ;;  %v766_v25 = vld [vmem:[%s1008_s1 + $0x38] sm:$0xff]   ;;  %v767_v28 = vld [vmem:[%s1009_s0] ss:$16 sps:$4 sm:$0xff]  }
   0xa   :  { %344 = vmatpush1.bf16.msra.mxu1 %v746_v5  ;;  %322 = vmatprep.mubr.bf16.mxu0 %v769_v24  ;;  %v774_v26 = vld [vmem:[%s1009_s0 + $0xc] ss:$16 sps:$4 sm:$0xff]   ;;  %v775_v29 = vld [vmem:[%s1009_s0 + $0x24] ss:$16 sps:$4 sm:$0xff]   ;;  %v777_v32 = vld [vmem:[%s1009_s0 + $0x20] ss:$16 sps:$4 sm:$0xff]  }
   0xb   :  { %345 = vmatprep.subr.bf16.mxu1 %v783_v0  ;;  %612 = vmatprep.mubr.msk.bf16.mxu1 %vm283_vm0, %v774_v26  ;;  %v770_v30 = vld [vmem:[%s1008_s1 + $0xc8] sm:$0xff]   ;;  %v771_v31 = vld [vmem:[%s1008_s1 + $0xd0] sm:$0xff]   ;;  %v412_v37 = vld [vmem:[%s1010_s2] sm:$0xff] }
   0xc   :  { %638 = vmatpush3.bf16.msra.mxu0 %v751_v9  ;;  %v772_v33 = vld [vmem:[%s1009_s0 + $0x8] ss:$16 sps:$4 sm:$0xff]   ;;  %v778_v34 = vld [vmem:[%s1009_s0 + $0x2c] ss:$16 sps:$4 sm:$0xff]   ;;  %v414_v40 = vld [vmem:[%s1010_s2 + $0x10] sm:$0xff] }
   0xd   :  { %639 = vmatprep.subr.bf16.mxu0 %v753_v11  ;;  %v780_v35 = vld [vmem:[%s1009_s0 + $0x28] ss:$16 sps:$4 sm:$0xff]   ;;  %v416_v43 = vld [vmem:[%s1010_s2 + $0x20] sm:$0xff]  ;;  %v418_v46 = vld [vmem:[%s1010_s2 + $0x30] sm:$0xff] }
   0xe   :  { %346 = vmatpush1.bf16.msra.mxu1 %v749_v10  ;;  %v413_v38 = vld [vmem:[%s1010_s2 + $0x8] sm:$0xff]  ;;  %v415_v41 = vld [vmem:[%s1010_s2 + $0x18] sm:$0xff]  ;;  %v420_v49 = vld [vmem:[%s1010_s2 + $0x40] sm:$0xff] }
   0xf   :  { %347 = vmatprep.subr.bf16.mxu1 %v783_v0  ;;  %v714_v39 = vpack.c.bf16 %v413_v38, %v412_v37  ;;  %v717_v42 = vpack.c.bf16 %v415_v41, %v414_v40  ;;  %v417_v44 = vld [vmem:[%s1010_s2 + $0x28] sm:$0xff]  ;;  %v419_v47 = vld [vmem:[%s1010_s2 + $0x38] sm:$0xff]  ;;  %v422_v52 = vld [vmem:[%s1010_s2 + $0x50] sm:$0xff] }
  0x10   :  { %640 = vmatpush3.bf16.msra.mxu0 %v754_v13  ;;  %v720_v45 = vpack.c.bf16 %v417_v44, %v416_v43  ;;  %v723_v48 = vpack.c.bf16 %v419_v47, %v418_v46  ;;  %v421_v50 = vld [vmem:[%s1010_s2 + $0x48] sm:$0xff]  ;;  %v423_v53 = vld [vmem:[%s1010_s2 + $0x58] sm:$0xff]  ;;  %v424_v55 = vld [vmem:[%s1010_s2 + $0x60] sm:$0xff] }
  0x11   :  { %641 = vmatprep.subr.bf16.mxu0 %v756_v14  ;;  %v726_v51 = vpack.c.bf16 %v421_v50, %v420_v49  ;;  %v729_v54 = vpack.c.bf16 %v423_v53, %v422_v52  ;;  %v425_v56 = vld [vmem:[%s1010_s2 + $0x68] sm:$0xff]  ;;  %v426_v58 = vld [vmem:[%s1010_s2 + $0x70] sm:$0xff]  ;;  %v427_v59 = vld [vmem:[%s1010_s2 + $0x78] sm:$0xff]  ;;  %v787_v53 = vmov 1966171168  }
  0x12   :  { %348 = vmatpush1.bf16.msra.mxu1 %v752_v12  ;;  %v732_v57 = vpack.c.bf16 %v425_v56, %v424_v55  ;;  %v735_v60 = vpack.c.bf16 %v427_v59, %v426_v58  ;;  %v513_v55 = vlaneseq }
  0x13   :  { %349 = vmatprep.subr.bf16.mxu1 %v783_v0 }
  0x14   :  { %642 = vmatpush3.bf16.msra.mxu0 %v757_v16 }
  0x15   :  { %643 = vmatprep.subr.bf16.mxu0 %v759_v17 }
  0x16   :  { %350 = vmatpush1.bf16.msra.mxu1 %v755_v15 }
  0x17   :  { %351 = vmatprep.subr.bf16.mxu1 %v783_v0 }
  0x18   :  { %644 = vmatpush3.bf16.msra.mxu0 %v760_v19 }
  0x19   :  { %645 = vmatprep.subr.bf16.mxu0 %v762_v20 }
  0x1a   :  { %352 = vmatpush1.bf16.msra.mxu1 %v758_v18 }
  0x1b   :  { %353 = vmatprep.subr.bf16.mxu1 %v783_v0 }
  0x1c   :  { %646 = vmatpush3.bf16.msra.mxu0 %v763_v22 }
  0x1d   :  { %647 = vmatprep.subr.bf16.mxu0 %v765_v23 }
  0x1e   :  { %354 = vmatpush1.bf16.msra.mxu1 %v761_v21 }
  0x1f   :  { %355 = vmatprep.subr.bf16.mxu1 %v783_v0 }
  0x20   :  { %648 = vmatpush3.bf16.msra.mxu0 %v766_v25 }
  0x21   :  { %713 = vmatprep.subr.bf16.mxu0 %v784_v36 }
  0x22   :  { %356 = vmatpush1.bf16.msra.mxu1 %v764_v27 }
  0x23   :  { %357 = vmatprep.subr.bf16.mxu1 %v783_v0  ;;  %323 = vmatmul.mubr.bf16.vlgmr.msra.gmra.mrb[0].mxu0 %v767_v28 }
  0x24   :  { %330 = vmatprep.mubr.bf16.mxu0 %v775_v29  ;;  %715 = vmatpush3.bf16.msra.mxu0 %v714_v39 }
  0x25   :  { %716 = vmatprep.subr.bf16.mxu0 %v784_v36 }
  0x26   :  { %358 = vmatpush1.bf16.msra.mxu1 %v770_v30 }
  0x27   :  { %359 = vmatprep.subr.bf16.mxu1 %v783_v0 }
  0x28   :  { %718 = vmatpush3.bf16.msra.mxu0 %v717_v42 }
  0x29   :  { %719 = vmatprep.subr.bf16.mxu0 %v784_v36 }
  0x2a   :  { %360 = vmatpush1.bf16.msra.mxu1 %v771_v31 }
  0x2b   :  { %331 = vmatmul.mubr.bf16.gmra.mrb[4].mxu0 %v777_v32 }
  0x2c   :  { %721 = vmatpush3.bf16.msra.mxu0 %v720_v45  ;;  %710 = vmatprep.mubr.msk.f32.mxu0 %vm785_vm1, %v786_v61 }
  0x2d   :  { %372 = vmatmul.mubr.bf16.vlgmr.msra.gmra.mrb[0].mxu1 %v772_v33  ;;  %722 = vmatprep.subr.bf16.mxu0 %v784_v36 }
  0x2e   :  { %613 = vmatprep.mubr.msk.bf16.mxu1 %vm283_vm0, %v778_v34 }
  0x30   :  { %724 = vmatpush3.bf16.msra.mxu0 %v723_v48 }
  0x31   :  { %725 = vmatprep.subr.bf16.mxu0 %v784_v36 }
  0x34   :  { %727 = vmatpush3.bf16.msra.mxu0 %v726_v51 }
  0x35   :  { %380 = vmatmul.mubr.bf16.gmra.mrb[4].mxu1 %v780_v35  ;;  %728 = vmatprep.subr.bf16.mxu0 %v784_v36 }
  0x38   :  { %730 = vmatpush3.bf16.msra.mxu0 %v729_v54  ;;  %v511_v54 = vunpack.c.l.s4 %v787_v53 }
  0x39   :  { %731 = vmatprep.subr.bf16.mxu0 %v784_v36 }
  0x3a   :  { %v512_v56 = vunpack.c.0.s8 %v511_v54 }
  0x3c   :  { %733 = vmatpush3.bf16.msra.mxu0 %v732_v57  ;;  %v514_v57 = vshrl.u32 %v513_v55, 7 }
  0x3d   :  { %734 = vmatprep.subr.bf16.mxu0 %v784_v36 }
  0x3e   :  { %v515_v58 = vsub.s32 %v512_v56, %v514_v57 }
  0x40   :  { %736 = vmatpush3.bf16.msra.mxu0 %v735_v60 }
  0xf6   :  { %v649_v62 = vpop.f32.mrb[0].mxu0 }
  0xf7   :  { %v650_v63 = vpop.f32.mrb[1].mxu0 }
  0xf8   :  { %v651_v0 = vadd.f32 %v650_v63, %v649_v62  ;;  %v652_v1 = vpop.f32.mrb[2].mxu0  ;;  %v498_v62 = vld [vmem:[%s1011_s3] sm:$0x1] }
  0xf9   :  { %v653_v2 = vpop.f32.mrb[3].mxu0 }
  0xfa   :  { %v654_v3 = vadd.f32 %v653_v2, %v652_v1  ;;  %v499_v2 = vld [vmem:[%s1012_s4] sm:$0x1] }
  0xfe   :  { %v655_v4 = vpop.f32.mrb[4].mxu0 }
  0xff   :  { %v656_v6 = vpop.f32.mrb[5].mxu0 }
 0x100   :  { %v373_v5 = vpop.f32.mrb[0].mxu1  ;;  %v657_v9 = vadd.f32 %v656_v6, %v655_v4  ;;  %v658_v10 = vpop.f32.mrb[6].mxu0 }
 0x101   :  { %v984_v7 = vadd.f32 %v651_v0, %v373_v5  ;;  %v375_v8 = vpop.f32.mrb[1].mxu1  ;;  %v659_v12 = vpop.f32.mrb[7].mxu0  ;;  %v532_v0 = vsub.s32 0, %v514_v57 }
 0x102   :  { %v376_v11 = vpop.f32.mrb[2].mxu1  ;;  %v660_v15 = vadd.f32 %v659_v12, %v658_v10 }
 0x103   :  { %v986_v13 = vadd.f32 %v654_v3, %v376_v11  ;;  %v378_v14 = vpop.f32.mrb[3].mxu1  ;;  %v397_v18 = vmul.f32 %v984_v7, %v984_v7 }
 0x105   :  { %v398_v16 = vmul.f32 %v986_v13, %v986_v13  ;;  %v388_v19 = vadd.f32 %v986_v13, %v984_v7 }
 0x107   :  { %v401_v23 = vadd.f32 %v398_v16, %v397_v18 }
 0x108   :  { %v381_v17 = vpop.f32.mrb[4].mxu1 }
 0x109   :  { %v382_v20 = vadd.f32 %v657_v9, %v381_v17  ;;  %v383_v21 = vpop.f32.mrb[5].mxu1 }
 0x10a   :  { %v384_v22 = vpop.f32.mrb[6].mxu1 }
 0x10b   :  { %v389_v24 = vadd.f32 %v388_v19, %v382_v20  ;;  %v399_v25 = vmul.f32 %v382_v20, %v382_v20  ;;  %v385_v26 = vadd.f32 %v660_v15, %v384_v22  ;;  %v386_v27 = vpop.f32.mrb[7].mxu1 }
 0x10d   :  { %v402_v28 = vadd.f32 %v401_v23, %v399_v25  ;;  %v390_v29 = vadd.f32 %v389_v24, %v385_v26  ;;  %v400_v30 = vmul.f32 %v385_v26, %v385_v26 }
 0x10f   :  { %v391_v31 = vrot.slane %v390_v29, 4  ;;  %v403_v32 = vadd.f32 %v402_v28, %v400_v30 }
 0x111   :  { %v392_v33 = vadd.f32 %v391_v31, %v390_v29  ;;  %v404_v34 = vrot.slane %v403_v32, 4 }
 0x113   :  { %v393_v35 = vrot.slane %v392_v33, 2  ;;  %v405_v36 = vadd.f32 %v404_v34, %v403_v32 }
 0x115   :  { %v394_v37 = vadd.f32 %v393_v35, %v392_v33  ;;  %v406_v38 = vrot.slane %v405_v36, 2 }
 0x117   :  { %v395_v39 = vrot.slane %v394_v37, 1  ;;  %v407_v40 = vadd.f32 %v406_v38, %v405_v36 }
 0x119   :  { %v408_v41 = vrot.slane %v407_v40, 1  ;;  %v396_v42 = vadd.f32 %v395_v39, %v394_v37 }
 0x11b   :  { %v409_v43 = vadd.f32 %v408_v41, %v407_v40 }
 0x11d   :  { %v411_v44 = vsel %vm410_vm2, %v396_v42, %v409_v43 }
 0x11e   :  { %711 = vmatmul.mubr.f32.vlgmr.msra.gmra.mrb[8].mxu0 %v411_v44 }
 0x1f1   :  { %v494_v45 = vpop.f32.mrb[8].mxu0 }
 0x1f2   :  { %v500_v46 = vmul.f32 0.0078125, %v494_v45  ;;  %v712_v47 = vpop.f32.mrb[9].mxu0 }
 0x1f4   :  { %v501_v48 = vmul.f32 %v500_v46, %v500_v46 }
 0x1f6   :  { %v503_v49 = vrot.slane %v501_v48, 7 }
 0x1f8   :  { %v505_v50 = vsub.f32 %v500_v46, %v503_v49 }
 0x1fa   :  { %v506_v51 = vmax.f32 %v505_v50, 0.0 }
 0x1fc   :  { %v507_v52 = vadd.f32 1e-05, %v506_v51 }
 0x1fe   :  { %781 = vrsqrt.f32 %v507_v52 }
 0x208   :  { %v782_v59 = vpop.eup %781 }
 0x209   :  { %v516_v60 = vrot.slane %v782_v59, %v515_v58 }
 0x20b   :  { %v517_v61 = vcombine.high %v516_v60, %v516_v60 }
 0x20d   :  { %v524_v63 = vrot.slane %v517_v61, %v515_v58 }
 0x20f   :  { %v526_v1 = vmul.f32 %v524_v63, %v498_v62 }
 0x211   :  { %v527_v3 = vmul.f32 %v526_v1, %v500_v46  ;;  %v533_v4 = vrot.slane %v526_v1, %v532_v0 }
 0x213   :  { %v528_v5 = vsub.f32 %v499_v2, %v527_v3  ;;  %v535_v6 = vmul.f32 %v533_v4, %v984_v7  ;;  %v536_v8 = vmul.f32 %v533_v4, %v986_v13  ;;  %v537_v9 = vmul.f32 %v533_v4, %v382_v20 }
 0x214   :  { %v538_v10 = vmul.f32 %v533_v4, %v385_v26 }
 0x215   :  { %v543_v11 = vrot.slane %v528_v5, %v532_v0 }
 0x217   :  { %v545_v12 = vadd.f32 %v543_v11, %v535_v6  ;;  %v546_v14 = vadd.f32 %v543_v11, %v536_v8  ;;  %v547_v15 = vadd.f32 %v543_v11, %v537_v9  ;;  %v548_v16 = vadd.f32 %v543_v11, %v538_v10 }
 0x219   :  { %v549_v17 = vmax.f32 %v545_v12, 0.0  ;;  %v550_v18 = vmax.f32 %v546_v14, 0.0  ;;  %v551_v19 = vmax.f32 %v547_v15, 0.0  ;;  %v552_v21 = vmax.f32 %v548_v16, 0.0 }
 0x21b   :  { %v625_v22 = vpack.c.bf16 %v550_v18, %v549_v17  ;;  %v630_v23 = vpack.c.bf16 %v552_v21, %v551_v19 }
 0x21d   :  { %626 = vst [vmem:[%s1013_s5] sm:$0xff] %v625_v22   ;;  %632 = vst [vmem:[%s1013_s5 + $0x8] sm:$0xff] %v630_v23  }

// kernel: _lambda_.11
= control target key start
LH: loop header
LB: loop body
LE: loop exit
PB: predicated region body
PF: predicated region fallthrough
CT: control target
= control target key end

     0   :  { %v458_v0 = vmov 0   ;;  %vm182_vm0 = vcmask 130048   ;;  %s631_s1 = inlined_call_operand.vmem [shape: bf16[144,128], index: 1, kind: input, shape index: {}]   ;;  %s632_s0 = inlined_call_operand.vmem [shape: bf16[128,144], index: 0, kind: input, shape index: {}]   ;;  %s633_s2 = inlined_call_operand.vmem [shape: f32[1,128], index: 2, kind: input, shape index: {}]   ;;  %s634_s3 = inlined_call_operand.vmem [shape: f32[128,128], index: 3, kind: output, shape index: {}]  }
   0x1   :  { %207 = vmatprep.subr.bf16.mxu0 %v458_v0  ;;  %374 = vmatprep.subr.bf16.mxu1 %v458_v0  ;;  %v393_v1 = vld [vmem:[%s631_s1] sm:$0xff]   ;;  %v394_v2 = vld [vmem:[%s631_s1 + $0x8] sm:$0xff]   ;;  %v395_v3 = vld [vmem:[%s631_s1 + $0x10] sm:$0xff]  }
   0x2   :  { %208 = vmatpush1.bf16.msra.mxu0 %v393_v1  ;;  %383 = vmatpush1.bf16.msra.mxu1 %v393_v1  ;;  %v396_v4 = vld [vmem:[%s631_s1 + $0x18] sm:$0xff]   ;;  %v404_v5 = vld [vmem:[%s632_s0 + $0x4] ss:$8 sps:$4 sm:$0xff]   ;;  %v399_v9 = vld [vmem:[%s631_s1 + $0x30] sm:$0xff]  }
   0x3   :  { %209 = vmatprep.subr.bf16.mxu0 %v458_v0  ;;  %375 = vmatprep.subr.bf16.mxu1 %v458_v0  ;;  %v407_v6 = vld [vmem:[%s632_s0 + $0x44] ss:$8 sps:$4 sm:$0xff]   ;;  %v400_v10 = vld [vmem:[%s631_s1 + $0x38] sm:$0xff]   ;;  %v402_v12 = vld [vmem:[%s632_s0] ss:$8 sps:$4 sm:$0xff]  }
   0x4   :  { %366 = vmatprep.mubr.msk.bf16.mxu0 %vm182_vm0, %v404_v5  ;;  %370 = vmatprep.mubr.msk.bf16.mxu1 %vm182_vm0, %v407_v6  ;;  %v397_v7 = vld [vmem:[%s631_s1 + $0x20] sm:$0xff]   ;;  %v398_v8 = vld [vmem:[%s631_s1 + $0x28] sm:$0xff]   ;;  %v408_v14 = vld [vmem:[%s632_s0 + $0x14] ss:$8 sps:$4 sm:$0xff]  }
   0x5   :  { %v401_v11 = vld [vmem:[%s631_s1 + $0x40] sm:$0xff]   ;;  %v410_v15 = vld [vmem:[%s632_s0 + $0x54] ss:$8 sps:$4 sm:$0xff]   ;;  %v412_v16 = vld [vmem:[%s632_s0 + $0x10] ss:$8 sps:$4 sm:$0xff]  }
   0x6   :  { %210 = vmatpush1.bf16.msra.mxu0 %v394_v2  ;;  %384 = vmatpush1.bf16.msra.mxu1 %v394_v2  ;;  %v405_v13 = vld [vmem:[%s632_s0 + $0x40] ss:$8 sps:$4 sm:$0xff]   ;;  %v413_v17 = vld [vmem:[%s632_s0 + $0x50] ss:$8 sps:$4 sm:$0xff]   ;;  %v414_v18 = vld [vmem:[%s632_s0 + $0x24] ss:$8 sps:$4 sm:$0xff]  }
   0x7   :  { %211 = vmatprep.subr.bf16.mxu0 %v458_v0  ;;  %376 = vmatprep.subr.bf16.mxu1 %v458_v0  ;;  %v416_v19 = vld [vmem:[%s632_s0 + $0x64] ss:$8 sps:$4 sm:$0xff]   ;;  %v418_v20 = vld [vmem:[%s632_s0 + $0x20] ss:$8 sps:$4 sm:$0xff]   ;;  %v420_v22 = vld [vmem:[%s632_s0 + $0x34] ss:$8 sps:$4 sm:$0xff]  }
   0x8   :  { %v419_v21 = vld [vmem:[%s632_s0 + $0x60] ss:$8 sps:$4 sm:$0xff]   ;;  %v422_v23 = vld [vmem:[%s632_s0 + $0x74] ss:$8 sps:$4 sm:$0xff]   ;;  %v424_v24 = vld [vmem:[%s632_s0 + $0x30] ss:$8 sps:$4 sm:$0xff]  }
   0x9   :  { %v425_v25 = vld [vmem:[%s632_s0 + $0x70] ss:$8 sps:$4 sm:$0xff]   ;;  %v565_v26 = vld [vmem:[%s633_s2] ss:$0 sm:$0xff] }
   0xa   :  { %212 = vmatpush1.bf16.msra.mxu0 %v395_v3  ;;  %385 = vmatpush1.bf16.msra.mxu1 %v395_v3 }
   0xb   :  { %213 = vmatprep.subr.bf16.mxu0 %v458_v0  ;;  %377 = vmatprep.subr.bf16.mxu1 %v458_v0 }
   0xe   :  { %214 = vmatpush1.bf16.msra.mxu0 %v396_v4  ;;  %386 = vmatpush1.bf16.msra.mxu1 %v396_v4 }
   0xf   :  { %215 = vmatprep.subr.bf16.mxu0 %v458_v0  ;;  %378 = vmatprep.subr.bf16.mxu1 %v458_v0 }
  0x12   :  { %216 = vmatpush1.bf16.msra.mxu0 %v397_v7  ;;  %387 = vmatpush1.bf16.msra.mxu1 %v397_v7 }
  0x13   :  { %217 = vmatprep.subr.bf16.mxu0 %v458_v0  ;;  %379 = vmatprep.subr.bf16.mxu1 %v458_v0 }
  0x16   :  { %218 = vmatpush1.bf16.msra.mxu0 %v398_v8  ;;  %388 = vmatpush1.bf16.msra.mxu1 %v398_v8 }
  0x17   :  { %219 = vmatprep.subr.bf16.mxu0 %v458_v0  ;;  %380 = vmatprep.subr.bf16.mxu1 %v458_v0 }
  0x1a   :  { %220 = vmatpush1.bf16.msra.mxu0 %v399_v9  ;;  %389 = vmatpush1.bf16.msra.mxu1 %v399_v9 }
  0x1b   :  { %221 = vmatprep.subr.bf16.mxu0 %v458_v0  ;;  %381 = vmatprep.subr.bf16.mxu1 %v458_v0 }
  0x1e   :  { %222 = vmatpush1.bf16.msra.mxu0 %v400_v10  ;;  %390 = vmatpush1.bf16.msra.mxu1 %v400_v10 }
  0x1f   :  { %223 = vmatprep.subr.bf16.mxu0 %v458_v0  ;;  %382 = vmatprep.subr.bf16.mxu1 %v458_v0 }
  0x22   :  { %224 = vmatpush1.bf16.msra.mxu0 %v401_v11  ;;  %391 = vmatpush1.bf16.msra.mxu1 %v401_v11 }
  0x25   :  { %240 = vmatmul.mubr.bf16.vlgmr.msra.gmra.mrb[0].mxu0 %v402_v12  ;;  %272 = vmatmul.mubr.bf16.vlgmr.msra.gmra.mrb[0].mxu1 %v405_v13 }
  0x26   :  { %367 = vmatprep.mubr.msk.bf16.mxu0 %vm182_vm0, %v408_v14  ;;  %371 = vmatprep.mubr.msk.bf16.mxu1 %vm182_vm0, %v410_v15 }
  0x2d   :  { %248 = vmatmul.mubr.bf16.gmra.mrb[4].mxu0 %v412_v16  ;;  %280 = vmatmul.mubr.bf16.gmra.mrb[4].mxu1 %v413_v17 }
  0x2e   :  { %368 = vmatprep.mubr.msk.bf16.mxu0 %vm182_vm0, %v414_v18  ;;  %372 = vmatprep.mubr.msk.bf16.mxu1 %vm182_vm0, %v416_v19 }
  0x35   :  { %256 = vmatmul.mubr.bf16.gmra.mrb[8].mxu0 %v418_v20  ;;  %288 = vmatmul.mubr.bf16.gmra.mrb[8].mxu1 %v419_v21 }
  0x36   :  { %369 = vmatprep.mubr.msk.bf16.mxu0 %vm182_vm0, %v420_v22  ;;  %373 = vmatprep.mubr.msk.bf16.mxu1 %vm182_vm0, %v422_v23 }
  0x3d   :  { %264 = vmatmul.mubr.bf16.gmra.mrb[12].mxu0 %v424_v24  ;;  %296 = vmatmul.mubr.bf16.gmra.mrb[12].mxu1 %v425_v25 }
  0xf8   :  { %v241_v27 = vpop.f32.mrb[0].mxu0  ;;  %v273_v28 = vpop.f32.mrb[0].mxu1 }
  0xf9   :  { %v242_v29 = vadd.f32 %v565_v26, %v241_v27  ;;  %v274_v30 = vadd.f32 %v565_v26, %v273_v28  ;;  %v243_v31 = vpop.f32.mrb[1].mxu0  ;;  %v275_v32 = vpop.f32.mrb[1].mxu1 }
  0xfa   :  { %v244_v33 = vpop.f32.mrb[2].mxu0  ;;  %v276_v34 = vpop.f32.mrb[2].mxu1 }
  0xfb   :  { %426 = vtanh.f32 %v242_v29  ;;  %v245_v35 = vadd.f32 %v565_v26, %v244_v33  ;;  %v277_v36 = vadd.f32 %v565_v26, %v276_v34  ;;  %v246_v37 = vpop.f32.mrb[3].mxu0  ;;  %v278_v38 = vpop.f32.mrb[3].mxu1 }
  0xfc   :  { %428 = vtanh.f32 %v274_v30 }
  0xfd   :  { %430 = vtanh.f32 %v245_v35 }
  0xfe   :  { %432 = vtanh.f32 %v277_v36 }
 0x100   :  { %v249_v39 = vpop.f32.mrb[4].mxu0  ;;  %v281_v40 = vpop.f32.mrb[4].mxu1 }
 0x101   :  { %v250_v41 = vadd.f32 %v565_v26, %v249_v39  ;;  %v282_v42 = vadd.f32 %v565_v26, %v281_v40  ;;  %v251_v43 = vpop.f32.mrb[5].mxu0  ;;  %v283_v44 = vpop.f32.mrb[5].mxu1 }
 0x102   :  { %v252_v45 = vpop.f32.mrb[6].mxu0  ;;  %v284_v46 = vpop.f32.mrb[6].mxu1 }
 0x103   :  { %434 = vtanh.f32 %v250_v41  ;;  %v253_v47 = vadd.f32 %v565_v26, %v252_v45  ;;  %v285_v48 = vadd.f32 %v565_v26, %v284_v46  ;;  %v254_v49 = vpop.f32.mrb[7].mxu0  ;;  %v286_v50 = vpop.f32.mrb[7].mxu1 }
 0x104   :  { %436 = vtanh.f32 %v282_v42 }
 0x105   :  { %v427_v51 = vpop.eup %426  ;;  %438 = vtanh.f32 %v253_v47 }
 0x106   :  { %v429_v52 = vpop.eup %428  ;;  %320 = vst [vmem:[%s634_s3] sm:$0xff] %v427_v51  ;;  %440 = vtanh.f32 %v285_v48 }
 0x107   :  { %v431_v53 = vpop.eup %430  ;;  %328 = vst [vmem:[%s634_s3 + $0x40] sm:$0xff] %v429_v52 }
 0x108   :  { %v433_v54 = vpop.eup %432  ;;  %321 = vst [vmem:[%s634_s3 + $0x8] sm:$0xff] %v431_v53  ;;  %v257_v55 = vpop.f32.mrb[8].mxu0 }
 0x109   :  { %v289_v56 = vpop.f32.mrb[8].mxu1  ;;  %329 = vst [vmem:[%s634_s3 + $0x48] sm:$0xff] %v433_v54  ;;  %v258_v57 = vadd.f32 %v565_v26, %v257_v55  ;;  %v259_v59 = vpop.f32.mrb[9].mxu0 }
 0x10a   :  { %v290_v58 = vadd.f32 %v565_v26, %v289_v56  ;;  %v291_v60 = vpop.f32.mrb[9].mxu1  ;;  %v260_v61 = vpop.f32.mrb[10].mxu0 }
 0x10b   :  { %v292_v62 = vpop.f32.mrb[10].mxu1  ;;  %442 = vtanh.f32 %v258_v57  ;;  %v261_v63 = vadd.f32 %v565_v26, %v260_v61  ;;  %v262_v1 = vpop.f32.mrb[11].mxu0 }
 0x10c   :  { %v293_v0 = vadd.f32 %v565_v26, %v292_v62  ;;  %v294_v2 = vpop.f32.mrb[11].mxu1  ;;  %444 = vtanh.f32 %v290_v58 }
 0x10d   :  { %v435_v3 = vpop.eup %434  ;;  %446 = vtanh.f32 %v261_v63 }
 0x10e   :  { %v437_v4 = vpop.eup %436  ;;  %322 = vst [vmem:[%s634_s3 + $0x10] sm:$0xff] %v435_v3  ;;  %448 = vtanh.f32 %v293_v0 }
 0x10f   :  { %v439_v5 = vpop.eup %438  ;;  %330 = vst [vmem:[%s634_s3 + $0x50] sm:$0xff] %v437_v4 }
 0x110   :  { %v441_v6 = vpop.eup %440  ;;  %323 = vst [vmem:[%s634_s3 + $0x18] sm:$0xff] %v439_v5  ;;  %v265_v7 = vpop.f32.mrb[12].mxu0 }
 0x111   :  { %v297_v8 = vpop.f32.mrb[12].mxu1  ;;  %331 = vst [vmem:[%s634_s3 + $0x58] sm:$0xff] %v441_v6  ;;  %v266_v9 = vadd.f32 %v565_v26, %v265_v7  ;;  %v267_v11 = vpop.f32.mrb[13].mxu0 }
 0x112   :  { %v298_v10 = vadd.f32 %v565_v26, %v297_v8  ;;  %v299_v12 = vpop.f32.mrb[13].mxu1  ;;  %v268_v13 = vpop.f32.mrb[14].mxu0 }
 0x113   :  { %v300_v14 = vpop.f32.mrb[14].mxu1  ;;  %450 = vtanh.f32 %v266_v9  ;;  %v269_v15 = vadd.f32 %v565_v26, %v268_v13  ;;  %v270_v17 = vpop.f32.mrb[15].mxu0 }
 0x114   :  { %v301_v16 = vadd.f32 %v565_v26, %v300_v14  ;;  %v302_v18 = vpop.f32.mrb[15].mxu1  ;;  %452 = vtanh.f32 %v298_v10 }
 0x115   :  { %v443_v19 = vpop.eup %442  ;;  %454 = vtanh.f32 %v269_v15 }
 0x116   :  { %v445_v20 = vpop.eup %444  ;;  %324 = vst [vmem:[%s634_s3 + $0x20] sm:$0xff] %v443_v19  ;;  %456 = vtanh.f32 %v301_v16 }
 0x117   :  { %v447_v21 = vpop.eup %446  ;;  %332 = vst [vmem:[%s634_s3 + $0x60] sm:$0xff] %v445_v20 }
 0x118   :  { %v449_v22 = vpop.eup %448  ;;  %325 = vst [vmem:[%s634_s3 + $0x28] sm:$0xff] %v447_v21 }
 0x119   :  { %333 = vst [vmem:[%s634_s3 + $0x68] sm:$0xff] %v449_v22 }
 0x11d   :  { %v451_v23 = vpop.eup %450 }
 0x11e   :  { %v453_v24 = vpop.eup %452  ;;  %326 = vst [vmem:[%s634_s3 + $0x30] sm:$0xff] %v451_v23 }
 0x11f   :  { %v455_v25 = vpop.eup %454  ;;  %334 = vst [vmem:[%s634_s3 + $0x70] sm:$0xff] %v453_v24 }
 0x120   :  { %v457_v26 = vpop.eup %456  ;;  %327 = vst [vmem:[%s634_s3 + $0x38] sm:$0xff] %v455_v25 }
 0x121   :  { %335 = vst [vmem:[%s634_s3 + $0x78] sm:$0xff] %v457_v26 }

</bundles_post_ra>
